<compile_context>
chip_gen: v5e
topology: v5e:2x2
jax: 0.10.0
libtpu: 0.0.40
codegen_flags: <defaults>
</compile_context>

<pallas_src>
from functools import partial

import jax
import jax.numpy as jnp
from jax.experimental import pallas as pl
from jax.experimental.pallas import tpu as pltpu


def _first_layer_conv_kernel(x_ref, w_ref, o_ref, *, K, L, C, NB, pad_l, pad_r):
    # x_ref : (NB, C, L)   NB batch elements, NCL layout (VMEM)
    # w_ref : (K, F, C)    per-tap weight matrices (VMEM, resident across grid)
    # o_ref : (NB, F, L)   ReLU(conv) output for this batch block
    F_out = o_ref.shape[1]

    # Hoist invariants out of the batch loop (loads / broadcasts are not CSE'd).
    w_taps = [w_ref[k] for k in range(K)]                     # K x (F, C)
    zl = jnp.zeros((C, pad_l), jnp.float32) if pad_l > 0 else None
    zr = jnp.zeros((C, pad_r), jnp.float32) if pad_r > 0 else None

    for i in range(NB):                                       # static -> unrolled
        x = x_ref[i]                                          # (C, L)

        # 'same'-padded signal, built entirely in VMEM.
        parts = []
        if zl is not None:
            parts.append(zl)
        parts.append(x)
        if zr is not None:
            parts.append(zr)
        xp = jnp.concatenate(parts, axis=1) if len(parts) > 1 else x  # (C, L+K-1)

        acc = jnp.zeros((F_out, L), jnp.float32)
        for k in range(K):                                    # static -> unrolled
            acc = acc + jnp.dot(w_taps[k], xp[:, k:k + L],    # MXU (F,C)@(C,L)
                                preferred_element_type=jnp.float32)
        o_ref[i] = jnp.maximum(acc, 0.0)                      # ReLU


def _pick_batch_block(N, C, L, F_out, K):
    """Largest NB dividing N with >=2 grid steps and VMEM-safe block sizes."""
    bytes_per_elem = 4 * (C * L + F_out * L)                  # x tile + out tile (f32)
    w_bytes = 4 * K * F_out * C
    budget = 24 * 1024 * 1024                                 # leave pipeline headroom
    for nb in (8, 4, 2):
        if N % nb == 0 and N // nb >= 2:
            if 2 * nb * bytes_per_elem + 2 * w_bytes < budget:
                return nb
    return 1


def first_layer_conv(x, weight, kernel_size=12):
    """x: (N, 4, L) f32; weight: (filters, 4, K) as nn.Conv1d(4, filters, K).

    Returns ReLU(Conv1d(x, padding='same', bias=False)) of shape
    (N, filters, L), matching FirstLayerConv.forward with its defaults
    (use_bias=False, activation='relu').
    """
    N, C, L = x.shape
    F_out, Cw, K = weight.shape
    assert Cw == C and K == kernel_size
    pad_total = K - 1
    pad_l = pad_total // 2                 # PyTorch 'same' (asymmetric if K even)
    pad_r = pad_total - pad_l

    w_t = jnp.transpose(weight, (2, 0, 1)).astype(jnp.float32)     # (K, F, C)

    NB = _pick_batch_block(N, C, L, F_out, K)
    grid = (N // NB,)

    return pl.pallas_call(
        partial(_first_layer_conv_kernel, K=K, L=L, C=C, NB=NB,
                pad_l=pad_l, pad_r=pad_r),
        out_shape=jax.ShapeDtypeStruct((N, F_out, L), jnp.float32),
        grid=grid,
        in_specs=[
            pl.BlockSpec((NB, C, L), lambda n: (n, 0, 0)),          # activations
            pl.BlockSpec((K, F_out, C), lambda n: (0, 0, 0)),       # weights (resident)
        ],
        out_specs=pl.BlockSpec((NB, F_out, L), lambda n: (n, 0, 0)),
        compiler_params=pltpu.CompilerParams(
            dimension_semantics=("parallel",),
            vmem_limit_bytes=32 * 1024 * 1024,
        ),
    )(x.astype(jnp.float32), w_t)


def _reference(x, weight, kernel_size=12):
    N, C, L = x.shape
    K = kernel_size
    pad_total = K - 1
    pad_left = pad_total // 2
    pad_right = pad_total - pad_left
    xp = jnp.pad(x, ((0, 0), (0, 0), (pad_left, pad_right)))
    windows = jnp.stack([xp[:, :, k:k + L] for k in range(K)], axis=-1)  # (N,C,L,K)
    out = jnp.einsum("nclk,fck->nfl", windows, weight)
    return jnp.maximum(out, 0.0)


if __name__ == "__main__":
    # Small deterministic shapes consistent with the module:
    # batch=2, in_channels=4 (DNA one-hot), length=16, filters=128, K=12.
    N, C, L = 2, 4, 16
    FILTERS, K = 128, 12

    key = jax.random.PRNGKey(0)
    kx, kw = jax.random.split(key, 2)
    x = jax.random.normal(kx, (N, C, L), dtype=jnp.float32)
    weight = 0.1 * jax.random.normal(kw, (FILTERS, C, K), dtype=jnp.float32)

    out = first_layer_conv(x, weight, kernel_size=K)
    out = jax.block_until_ready(out)

    ref = _reference(x, weight, kernel_size=K)
    assert out.shape == (N, FILTERS, L)
    assert jnp.allclose(out, ref, atol=1e-4, rtol=1e-4)
    print("KERNEL_OK")
</pallas_src>

<mosaic_0001>
module attributes {stable_mosaic.version = 11 : i64} {
  func.func @_first_layer_conv_kernel(%arg0: i32, %arg1: memref<1x4x16xf32, #tpu.memory_space<vmem>>, %arg2: memref<12x128x4xf32, #tpu.memory_space<vmem>>, %arg3: memref<1x128x16xf32, #tpu.memory_space<vmem>>) attributes {dimension_semantics = [#tpu.dimension_semantics<parallel>], iteration_bounds = array<i64: 2>, scalar_prefetch = 0 : i64, scratch_operands = 0 : i64, tpu.core_type = #tpu.core_type<tc>, window_params = [{transform_indices = @transform_0, window_bounds = array<i64: 1, 4, 16>}, {pipeline_mode = #tpu.pipeline_mode<synchronous>, transform_indices = @transform_1, window_bounds = array<i64: 12, 128, 4>}, {transform_indices = @transform_2, window_bounds = array<i64: 1, 128, 16>}]} {
    %c0 = arith.constant 0 : index
    %c0_0 = arith.constant 0 : index
    %c0_1 = arith.constant 0 : index
    %0 = vector.load %arg2[%c0, %c0_0, %c0_1] : memref<12x128x4xf32, #tpu.memory_space<vmem>>, vector<1x128x4xf32>
    %1 = vector.shape_cast %0 : vector<1x128x4xf32> to vector<128x4xf32>
    %c1 = arith.constant 1 : index
    %c0_2 = arith.constant 0 : index
    %c0_3 = arith.constant 0 : index
    %2 = vector.load %arg2[%c1, %c0_2, %c0_3] : memref<12x128x4xf32, #tpu.memory_space<vmem>>, vector<1x128x4xf32>
    %3 = vector.shape_cast %2 : vector<1x128x4xf32> to vector<128x4xf32>
    %c2 = arith.constant 2 : index
    %c0_4 = arith.constant 0 : index
    %c0_5 = arith.constant 0 : index
    %4 = vector.load %arg2[%c2, %c0_4, %c0_5] : memref<12x128x4xf32, #tpu.memory_space<vmem>>, vector<1x128x4xf32>
    %5 = vector.shape_cast %4 : vector<1x128x4xf32> to vector<128x4xf32>
    %c3 = arith.constant 3 : index
    %c0_6 = arith.constant 0 : index
    %c0_7 = arith.constant 0 : index
    %6 = vector.load %arg2[%c3, %c0_6, %c0_7] : memref<12x128x4xf32, #tpu.memory_space<vmem>>, vector<1x128x4xf32>
    %7 = vector.shape_cast %6 : vector<1x128x4xf32> to vector<128x4xf32>
    %c4 = arith.constant 4 : index
    %c0_8 = arith.constant 0 : index
    %c0_9 = arith.constant 0 : index
    %8 = vector.load %arg2[%c4, %c0_8, %c0_9] : memref<12x128x4xf32, #tpu.memory_space<vmem>>, vector<1x128x4xf32>
    %9 = vector.shape_cast %8 : vector<1x128x4xf32> to vector<128x4xf32>
    %c5 = arith.constant 5 : index
    %c0_10 = arith.constant 0 : index
    %c0_11 = arith.constant 0 : index
    %10 = vector.load %arg2[%c5, %c0_10, %c0_11] : memref<12x128x4xf32, #tpu.memory_space<vmem>>, vector<1x128x4xf32>
    %11 = vector.shape_cast %10 : vector<1x128x4xf32> to vector<128x4xf32>
    %c6 = arith.constant 6 : index
    %c0_12 = arith.constant 0 : index
    %c0_13 = arith.constant 0 : index
    %12 = vector.load %arg2[%c6, %c0_12, %c0_13] : memref<12x128x4xf32, #tpu.memory_space<vmem>>, vector<1x128x4xf32>
    %13 = vector.shape_cast %12 : vector<1x128x4xf32> to vector<128x4xf32>
    %c7 = arith.constant 7 : index
    %c0_14 = arith.constant 0 : index
    %c0_15 = arith.constant 0 : index
    %14 = vector.load %arg2[%c7, %c0_14, %c0_15] : memref<12x128x4xf32, #tpu.memory_space<vmem>>, vector<1x128x4xf32>
    %15 = vector.shape_cast %14 : vector<1x128x4xf32> to vector<128x4xf32>
    %c8 = arith.constant 8 : index
    %c0_16 = arith.constant 0 : index
    %c0_17 = arith.constant 0 : index
    %16 = vector.load %arg2[%c8, %c0_16, %c0_17] : memref<12x128x4xf32, #tpu.memory_space<vmem>>, vector<1x128x4xf32>
    %17 = vector.shape_cast %16 : vector<1x128x4xf32> to vector<128x4xf32>
    %c9 = arith.constant 9 : index
    %c0_18 = arith.constant 0 : index
    %c0_19 = arith.constant 0 : index
    %18 = vector.load %arg2[%c9, %c0_18, %c0_19] : memref<12x128x4xf32, #tpu.memory_space<vmem>>, vector<1x128x4xf32>
    %19 = vector.shape_cast %18 : vector<1x128x4xf32> to vector<128x4xf32>
    %c10 = arith.constant 10 : index
    %c0_20 = arith.constant 0 : index
    %c0_21 = arith.constant 0 : index
    %20 = vector.load %arg2[%c10, %c0_20, %c0_21] : memref<12x128x4xf32, #tpu.memory_space<vmem>>, vector<1x128x4xf32>
    %21 = vector.shape_cast %20 : vector<1x128x4xf32> to vector<128x4xf32>
    %c11 = arith.constant 11 : index
    %c0_22 = arith.constant 0 : index
    %c0_23 = arith.constant 0 : index
    %22 = vector.load %arg2[%c11, %c0_22, %c0_23] : memref<12x128x4xf32, #tpu.memory_space<vmem>>, vector<1x128x4xf32>
    %23 = vector.shape_cast %22 : vector<1x128x4xf32> to vector<128x4xf32>
    %cst = arith.constant 0.000000e+00 : f32
    %24 = vector.broadcast %cst : f32 to vector<4x5xf32>
    %cst_24 = arith.constant 0.000000e+00 : f32
    %25 = vector.broadcast %cst_24 : f32 to vector<4x6xf32>
    %c0_25 = arith.constant 0 : index
    %c0_26 = arith.constant 0 : index
    %c0_27 = arith.constant 0 : index
    %26 = vector.load %arg1[%c0_25, %c0_26, %c0_27] : memref<1x4x16xf32, #tpu.memory_space<vmem>>, vector<1x4x16xf32>
    %27 = vector.shape_cast %26 : vector<1x4x16xf32> to vector<4x16xf32>
    %28 = tpu.concatenate %24, %27, %25 in 1 : vector<4x5xf32>, vector<4x16xf32>, vector<4x6xf32> -> vector<4x27xf32>
    %cst_28 = arith.constant 0.000000e+00 : f32
    %29 = vector.broadcast %cst_28 : f32 to vector<128x16xf32>
    %30 = vector.extract_strided_slice %28 {offsets = [0, 0], sizes = [4, 16], strides = [1, 1]} : vector<4x27xf32> to vector<4x16xf32>
    %cst_29 = arith.constant dense<0.000000e+00> : vector<128x16xf32>
    %31 = tpu.matmul %1, %30, %cst_29 {dimension_numbers = #tpu.dot_dimension_numbers<[1], [0], [0], [1], [0, 0, 1, 1], [], []>} : vector<128x4xf32>, vector<4x16xf32>, vector<128x16xf32> -> vector<128x16xf32>
    %32 = arith.addf %29, %31 : vector<128x16xf32>
    %33 = vector.extract_strided_slice %28 {offsets = [0, 1], sizes = [4, 16], strides = [1, 1]} : vector<4x27xf32> to vector<4x16xf32>
    %cst_30 = arith.constant dense<0.000000e+00> : vector<128x16xf32>
    %34 = tpu.matmul %3, %33, %cst_30 {dimension_numbers = #tpu.dot_dimension_numbers<[1], [0], [0], [1], [0, 0, 1, 1], [], []>} : vector<128x4xf32>, vector<4x16xf32>, vector<128x16xf32> -> vector<128x16xf32>
    %35 = arith.addf %32, %34 : vector<128x16xf32>
    %36 = vector.extract_strided_slice %28 {offsets = [0, 2], sizes = [4, 16], strides = [1, 1]} : vector<4x27xf32> to vector<4x16xf32>
    %cst_31 = arith.constant dense<0.000000e+00> : vector<128x16xf32>
    %37 = tpu.matmul %5, %36, %cst_31 {dimension_numbers = #tpu.dot_dimension_numbers<[1], [0], [0], [1], [0, 0, 1, 1], [], []>} : vector<128x4xf32>, vector<4x16xf32>, vector<128x16xf32> -> vector<128x16xf32>
    %38 = arith.addf %35, %37 : vector<128x16xf32>
    %39 = vector.extract_strided_slice %28 {offsets = [0, 3], sizes = [4, 16], strides = [1, 1]} : vector<4x27xf32> to vector<4x16xf32>
    %cst_32 = arith.constant dense<0.000000e+00> : vector<128x16xf32>
    %40 = tpu.matmul %7, %39, %cst_32 {dimension_numbers = #tpu.dot_dimension_numbers<[1], [0], [0], [1], [0, 0, 1, 1], [], []>} : vector<128x4xf32>, vector<4x16xf32>, vector<128x16xf32> -> vector<128x16xf32>
    %41 = arith.addf %38, %40 : vector<128x16xf32>
    %42 = vector.extract_strided_slice %28 {offsets = [0, 4], sizes = [4, 16], strides = [1, 1]} : vector<4x27xf32> to vector<4x16xf32>
    %cst_33 = arith.constant dense<0.000000e+00> : vector<128x16xf32>
    %43 = tpu.matmul %9, %42, %cst_33 {dimension_numbers = #tpu.dot_dimension_numbers<[1], [0], [0], [1], [0, 0, 1, 1], [], []>} : vector<128x4xf32>, vector<4x16xf32>, vector<128x16xf32> -> vector<128x16xf32>
    %44 = arith.addf %41, %43 : vector<128x16xf32>
    %45 = vector.extract_strided_slice %28 {offsets = [0, 5], sizes = [4, 16], strides = [1, 1]} : vector<4x27xf32> to vector<4x16xf32>
    %cst_34 = arith.constant dense<0.000000e+00> : vector<128x16xf32>
    %46 = tpu.matmul %11, %45, %cst_34 {dimension_numbers = #tpu.dot_dimension_numbers<[1], [0], [0], [1], [0, 0, 1, 1], [], []>} : vector<128x4xf32>, vector<4x16xf32>, vector<128x16xf32> -> vector<128x16xf32>
    %47 = arith.addf %44, %46 : vector<128x16xf32>
    %48 = vector.extract_strided_slice %28 {offsets = [0, 6], sizes = [4, 16], strides = [1, 1]} : vector<4x27xf32> to vector<4x16xf32>
    %cst_35 = arith.constant dense<0.000000e+00> : vector<128x16xf32>
    %49 = tpu.matmul %13, %48, %cst_35 {dimension_numbers = #tpu.dot_dimension_numbers<[1], [0], [0], [1], [0, 0, 1, 1], [], []>} : vector<128x4xf32>, vector<4x16xf32>, vector<128x16xf32> -> vector<128x16xf32>
    %50 = arith.addf %47, %49 : vector<128x16xf32>
    %51 = vector.extract_strided_slice %28 {offsets = [0, 7], sizes = [4, 16], strides = [1, 1]} : vector<4x27xf32> to vector<4x16xf32>
    %cst_36 = arith.constant dense<0.000000e+00> : vector<128x16xf32>
    %52 = tpu.matmul %15, %51, %cst_36 {dimension_numbers = #tpu.dot_dimension_numbers<[1], [0], [0], [1], [0, 0, 1, 1], [], []>} : vector<128x4xf32>, vector<4x16xf32>, vector<128x16xf32> -> vector<128x16xf32>
    %53 = arith.addf %50, %52 : vector<128x16xf32>
    %54 = vector.extract_strided_slice %28 {offsets = [0, 8], sizes = [4, 16], strides = [1, 1]} : vector<4x27xf32> to vector<4x16xf32>
    %cst_37 = arith.constant dense<0.000000e+00> : vector<128x16xf32>
    %55 = tpu.matmul %17, %54, %cst_37 {dimension_numbers = #tpu.dot_dimension_numbers<[1], [0], [0], [1], [0, 0, 1, 1], [], []>} : vector<128x4xf32>, vector<4x16xf32>, vector<128x16xf32> -> vector<128x16xf32>
    %56 = arith.addf %53, %55 : vector<128x16xf32>
    %57 = vector.extract_strided_slice %28 {offsets = [0, 9], sizes = [4, 16], strides = [1, 1]} : vector<4x27xf32> to vector<4x16xf32>
    %cst_38 = arith.constant dense<0.000000e+00> : vector<128x16xf32>
    %58 = tpu.matmul %19, %57, %cst_38 {dimension_numbers = #tpu.dot_dimension_numbers<[1], [0], [0], [1], [0, 0, 1, 1], [], []>} : vector<128x4xf32>, vector<4x16xf32>, vector<128x16xf32> -> vector<128x16xf32>
    %59 = arith.addf %56, %58 : vector<128x16xf32>
    %60 = vector.extract_strided_slice %28 {offsets = [0, 10], sizes = [4, 16], strides = [1, 1]} : vector<4x27xf32> to vector<4x16xf32>
    %cst_39 = arith.constant dense<0.000000e+00> : vector<128x16xf32>
    %61 = tpu.matmul %21, %60, %cst_39 {dimension_numbers = #tpu.dot_dimension_numbers<[1], [0], [0], [1], [0, 0, 1, 1], [], []>} : vector<128x4xf32>, vector<4x16xf32>, vector<128x16xf32> -> vector<128x16xf32>
    %62 = arith.addf %59, %61 : vector<128x16xf32>
    %63 = vector.extract_strided_slice %28 {offsets = [0, 11], sizes = [4, 16], strides = [1, 1]} : vector<4x27xf32> to vector<4x16xf32>
    %cst_40 = arith.constant dense<0.000000e+00> : vector<128x16xf32>
    %64 = tpu.matmul %23, %63, %cst_40 {dimension_numbers = #tpu.dot_dimension_numbers<[1], [0], [0], [1], [0, 0, 1, 1], [], []>} : vector<128x4xf32>, vector<4x16xf32>, vector<128x16xf32> -> vector<128x16xf32>
    %65 = arith.addf %62, %64 : vector<128x16xf32>
    %cst_41 = arith.constant 0.000000e+00 : f32
    %66 = vector.broadcast %cst_41 : f32 to vector<128x16xf32>
    %67 = arith.maximumf %65, %66 : vector<128x16xf32>
    %c0_42 = arith.constant 0 : index
    %c0_43 = arith.constant 0 : index
    %c0_44 = arith.constant 0 : index
    %68 = vector.load %arg3[%c0_42, %c0_43, %c0_44] : memref<1x128x16xf32, #tpu.memory_space<vmem>>, vector<1x128x16xf32>
    %69 = vector.shape_cast %68 : vector<1x128x16xf32> to vector<128x16xf32>
    %70 = vector.shape_cast %67 : vector<128x16xf32> to vector<1x128x16xf32>
    tpu.vector_store %arg3[%c0_42, %c0_43, %c0_44], %70 {strides = array<i32>} : memref<1x128x16xf32, #tpu.memory_space<vmem>>, vector<1x128x16xf32>,
    return
  }
  func.func @transform_0(%arg0: i32) -> (i32, i32, i32) {
    %c0_i32 = arith.constant 0 : i32
    %c0_i32_0 = arith.constant 0 : i32
    %c0_i32_1 = arith.constant 0 : i32
    return %arg0, %c0_i32, %c0_i32_0 : i32, i32, i32
  }
  func.func @transform_1(%arg0: i32) -> (i32, i32, i32) {
    %c0_i32 = arith.constant 0 : i32
    %c0_i32_0 = arith.constant 0 : i32
    %c0_i32_1 = arith.constant 0 : i32
    %c0_i32_2 = arith.constant 0 : i32
    return %c0_i32, %c0_i32_0, %c0_i32_1 : i32, i32, i32
  }
  func.func @transform_2(%arg0: i32) -> (i32, i32, i32) {
    %c0_i32 = arith.constant 0 : i32
    %c0_i32_0 = arith.constant 0 : i32
    %c0_i32_1 = arith.constant 0 : i32
    return %arg0, %c0_i32, %c0_i32_0 : i32, i32, i32
  }
}

</mosaic_0001>

<bundles_post_ra>
// kernel: tpu_custom_call.1
= control target key start
LH: loop header
LB: loop body
LE: loop exit
PB: predicated region body
PF: predicated region fallthrough
CT: control target
= control target key end

     0   :  { %s2452_s9 = smov 0   ;;  %s3383_s0 = inlined_call_operand.vmem [shape: f32[2,4,16], index: 0, kind: input, shape index: {}]   ;;  %s3384_s1 = inlined_call_operand.vmem [shape: f32[12,128,4], index: 1, kind: input, shape index: {}]   ;;  %s3385_s2 = inlined_call_operand.vmem [shape: f32[2,128,16], index: 2, kind: output, shape index: {}]  }
   0x1 LB: > { %s2006_s10 = sadd.s32 4294967295, %s2423_s9   ;;  %p2010_p0 = scmp.ge.s32.totalorder %s2423_s9, 1  ;;  %s2423_s9 = sphi %s2452_s9, %s12_s9  }
   0x2   : > { %p111_p1 = scmp.lt.s32.totalorder %s2423_s9, 3 }
   0x4   : > { %p112_p2 = pnand %p2010_p0, %p111_p1 }
   0x5   : > { %p132_p3 = scmp.lt.s32.totalorder (!%p112_p2), %s2006_s10, 1  ;;  %s2425_s15 = smov (!%p112_p2), 5  }
   0x6   : > { %115 = sbr.rel (%p112_p2) target bundleno = 769 (0x301), region = 28  ;;  %s2426_s16 = smov (!%p112_p2), 122  }
   0x7   : > { %s2427_s17 = smov (!%p112_p2), 127   ;;  %s2428_s18 = smov (!%p112_p2), 126  }
   0x8   : > { %s2429_s19 = smov (!%p112_p2), 124   ;;  %s2430_s20 = smov (!%p112_p2), 125  }
   0x9   : > { %s2431_s21 = smov (!%p112_p2), 121   ;;  %s2432_s22 = smov (!%p112_p2), 118  }
   0xa   : > { %s2433_s23 = smov (!%p112_p2), 123   ;;  %s2434_s24 = smov (!%p112_p2), 120  }
   0xb   : > { %s3387_s10 = smov (!%p132_p3, %s2006_s10), 1  ;;  %vm349_vm0 = vcmask 39936   ;;  %vm351_vm1 = vcmask 171008   ;;  %vm405_vm2 = vcmask 1043456   ;;  %s2435_s25 = smov 119   ;;  %vm356_vm3 = vcmask 31744  }
   0xc   : > { %s2011_s11 = sshll.u32 %s3387_s10, 2  ;;  %s2436_s26 = smov 117   ;;  %v141_v4 = vld [vmem:[%s3384_s1] sm:$0xff]  ;;  %v142_v5 = vld [vmem:[%s3384_s1 + $0x8] sm:$0xff]  ;;  %v143_v7 = vld [vmem:[%s3384_s1 + $0x10] sm:$0xff]  ;;  %vm1934_vm4 = vcmask 130048  }
   0xd   : > { %s135_s14 = scalar_lea.vmem %s3383_s0, %s2011_s11  ;;  %v144_v9 = vld [vmem:[%s3384_s1 + $0x18] sm:$0xff]  ;;  %v2014_v10 = vld [vmem:[%s3384_s1 + $0x80] sm:$0xff]  ;;  %v2015_v16 = vld [vmem:[%s3384_s1 + $0x88] sm:$0xff] }
   0xe   : > { %v344_v0 = vld [vmem:[%s135_s14] sm:$0xf]  ;;  %v2031_v19 = vld [vmem:[%s3384_s1 + $0x108] sm:$0xff]  ;;  %v2016_v24 = vld [vmem:[%s3384_s1 + $0x90] sm:$0xff] }
   0xf   : > { %346 = vrot.lane.b32.xlu0 %v344_v0, %s2425_s15  ;;  %v2030_v12 = vld [vmem:[%s3384_s1 + $0x100] sm:$0xff]  ;;  %v146_v21 = vld [vmem:[%s3384_s1 + $0x28] sm:$0xff]  ;;  %v2032_v25 = vld [vmem:[%s3384_s1 + $0x110] sm:$0xff] }
  0x10   : > { %v145_v14 = vld [vmem:[%s3384_s1 + $0x20] sm:$0xff]  ;;  %v2047_v22 = vld [vmem:[%s3384_s1 + $0x188] sm:$0xff]  ;;  %v147_v28 = vld [vmem:[%s3384_s1 + $0x30] sm:$0xff] }
  0x11   : > { %v2046_v17 = vld [vmem:[%s3384_s1 + $0x180] sm:$0xff]  ;;  %v2048_v29 = vld [vmem:[%s3384_s1 + $0x190] sm:$0xff]  ;;  %v2017_v31 = vld [vmem:[%s3384_s1 + $0x98] sm:$0xff] }
  0x12   : > { %v2033_v32 = vld [vmem:[%s3384_s1 + $0x118] sm:$0xff]  ;;  %v2018_v35 = vld [vmem:[%s3384_s1 + $0xa0] sm:$0xff]  ;;  %v2019_v39 = vld [vmem:[%s3384_s1 + $0xa8] sm:$0xff] }
  0x13   : > { %v148_v33 = vld [vmem:[%s3384_s1 + $0x38] sm:$0xff]  ;;  %v2034_v36 = vld [vmem:[%s3384_s1 + $0x120] sm:$0xff]  ;;  %v2035_v40 = vld [vmem:[%s3384_s1 + $0x128] sm:$0xff] }
  0x14   : > { %v2049_v34 = vld [vmem:[%s3384_s1 + $0x198] sm:$0xff]  ;;  %v149_v37 = vld [vmem:[%s3384_s1 + $0x40] sm:$0xff]  ;;  %v150_v41 = vld [vmem:[%s3384_s1 + $0x48] sm:$0xff] }
  0x15   : > { %v2050_v38 = vld [vmem:[%s3384_s1 + $0x1a0] sm:$0xff]  ;;  %v2051_v42 = vld [vmem:[%s3384_s1 + $0x1a8] sm:$0xff]  ;;  %v2020_v43 = vld [vmem:[%s3384_s1 + $0xb0] sm:$0xff] }
  0x16   : > { %v2036_v44 = vld [vmem:[%s3384_s1 + $0x130] sm:$0xff]  ;;  %v2021_v47 = vld [vmem:[%s3384_s1 + $0xb8] sm:$0xff]  ;;  %v2022_v51 = vld [vmem:[%s3384_s1 + $0xc0] sm:$0xff] }
  0x17   : > { %v151_v45 = vld [vmem:[%s3384_s1 + $0x50] sm:$0xff]  ;;  %v2037_v48 = vld [vmem:[%s3384_s1 + $0x138] sm:$0xff]  ;;  %v2038_v52 = vld [vmem:[%s3384_s1 + $0x140] sm:$0xff] }
  0x18   : > { %v2052_v46 = vld [vmem:[%s3384_s1 + $0x1b0] sm:$0xff]  ;;  %v152_v49 = vld [vmem:[%s3384_s1 + $0x58] sm:$0xff]  ;;  %v153_v53 = vld [vmem:[%s3384_s1 + $0x60] sm:$0xff] }
  0x19   : > { %v2053_v50 = vld [vmem:[%s3384_s1 + $0x1b8] sm:$0xff]  ;;  %v2054_v54 = vld [vmem:[%s3384_s1 + $0x1c0] sm:$0xff]  ;;  %v2023_v55 = vld [vmem:[%s3384_s1 + $0xc8] sm:$0xff] }
  0x1a   : > { %v2039_v56 = vld [vmem:[%s3384_s1 + $0x148] sm:$0xff]  ;;  %v2024_v59 = vld [vmem:[%s3384_s1 + $0xd0] sm:$0xff]  ;;  %v2025_v63 = vld [vmem:[%s3384_s1 + $0xd8] sm:$0xff] }
  0x1b   : > { %v154_v57 = vld [vmem:[%s3384_s1 + $0x68] sm:$0xff]  ;;  %v2040_v60 = vld [vmem:[%s3384_s1 + $0x150] sm:$0xff]  ;;  %v2041_v0 = vld [vmem:[%s3384_s1 + $0x158] sm:$0xff] }
  0x1c   : > { %v2055_v58 = vld [vmem:[%s3384_s1 + $0x1c8] sm:$0xff]  ;;  %v155_v61 = vld [vmem:[%s3384_s1 + $0x70] sm:$0xff] }
  0x1d   : > { %v2056_v62 = vld [vmem:[%s3384_s1 + $0x1d0] sm:$0xff] }
  0x81   : > { %v347_v1 = vpop.permute.xlu0 %346 }
  0x82   : > { %v350_v2 = vsel %vm349_vm0, 0.0, %v347_v1  ;;  %v156_v1 = vld [vmem:[%s3384_s1 + $0x78] sm:$0xff] }
  0x83   : > { %v352_v3 = vsel %vm351_vm1, %v350_v2, 0.0  ;;  %v2057_v2 = vld [vmem:[%s3384_s1 + $0x1d8] sm:$0xff] }
  0x84   : > { %1120 = vrot.lane.b32.xlu2 %v352_v3, %s2426_s16  ;;  %354 = vrot.lane.b32.xlu1 %v352_v3, %s2427_s17 }
  0x85   : > { %588 = vrot.lane.b32.xlu0 %v352_v3, %s2428_s18  ;;  %2207 = vmatpush.msk.msra.mxu1 %vm405_vm2, %v352_v3 }
  0x86   : > { %2208 = vmatmul.msk.f32.vlgmr.msra.gmra.mxu1 %vm356_vm3, %v141_v4  ;;  %v2042_v4 = vld [vmem:[%s3384_s1 + $0x160] sm:$0xff] }
  0x8c   : > { %854 = vrot.lane.b32.xlu2 %v352_v3, %s2429_s19  ;;  %721 = vrot.lane.b32.xlu1 %v352_v3, %s2430_s20 }
  0x8d   : > { %1253 = vrot.lane.b32.xlu0 %v352_v3, %s2431_s21  ;;  %s2396_s21 = sshll.u32 %s3387_s10, 7 }
  0x8e   : > { %2209 = vmatmul.msk.f32.gmra.mxu1 %vm356_vm3, %v142_v5 }
  0x94   : > { %1652 = vrot.lane.b32.xlu2 %v352_v3, %s2432_s22  ;;  %987 = vrot.lane.b32.xlu1 %v352_v3, %s2433_s23 }
  0x95   : > { %1386 = vrot.lane.b32.xlu0 %v352_v3, %s2434_s24  ;;  %s3332_s24 = scalar_lea.vmem %s3385_s2, %s2396_s21 }
  0x96   : > { %2210 = vmatmul.msk.f32.gmra.mxu1 %vm356_vm3, %v143_v7  ;;  %v2058_v7 = vld [vmem:[%s3384_s1 + $0x1e0] sm:$0xff] }
  0x9c   : > { %1519 = vrot.lane.b32.xlu2 %v352_v3, %s2435_s25  ;;  %1785 = vrot.lane.b32.xlu1 %v352_v3, %s2436_s26  ;;  %v2026_v3 = vld [vmem:[%s3384_s1 + $0xe0] sm:$0xff] }
  0x9e   : > { %2211 = vmatmul.msk.f32.gmra.mxu1 %vm356_vm3, %v144_v9  ;;  %v2043_v9 = vld [vmem:[%s3384_s1 + $0x168] sm:$0xff] }
  0xa6   : > { %2212 = vmatmul.msk.f32.gmra.mxu1 %vm356_vm3, %v145_v14  ;;  %v2044_v14 = vld [vmem:[%s3384_s1 + $0x170] sm:$0xff] }
  0xae   : > { %2213 = vmatmul.msk.f32.gmra.mxu1 %vm356_vm3, %v146_v21  ;;  %v2081_v21 = vld [vmem:[%s3384_s1 + $0x298] sm:$0xff] }
  0xb6   : > { %2214 = vmatmul.msk.f32.gmra.mxu1 %vm356_vm3, %v147_v28  ;;  %v2082_v28 = vld [vmem:[%s3384_s1 + $0x2a0] sm:$0xff] }
  0xbe   : > { %2215 = vmatmul.msk.f32.gmra.mxu1 %vm356_vm3, %v148_v33  ;;  %v2063_v33 = vld [vmem:[%s3384_s1 + $0x208] sm:$0xff] }
  0xc6   : > { %2216 = vmatmul.msk.f32.gmra.mxu1 %vm356_vm3, %v149_v37  ;;  %v2083_v37 = vld [vmem:[%s3384_s1 + $0x2a8] sm:$0xff] }
  0xce   : > { %2217 = vmatmul.msk.f32.gmra.mxu1 %vm356_vm3, %v150_v41 }
  0xd6   : > { %2218 = vmatmul.msk.f32.gmra.mxu1 %vm356_vm3, %v151_v45  ;;  %v2096_v45 = vld [vmem:[%s3384_s1 + $0x310] sm:$0xff] }
  0xde   : > { %v1121_v6 = vpop.permute.xlu2 %1120  ;;  %2219 = vmatmul.msk.f32.gmra.mxu1 %vm356_vm3, %v152_v49 }
  0xe6   : > { %v855_v8 = vpop.permute.xlu2 %854  ;;  %2220 = vmatmul.msk.f32.gmra.mxu1 %vm356_vm3, %v153_v53  ;;  %v2112_v53 = vld [vmem:[%s3384_s1 + $0x390] sm:$0xff] }
  0xee   : > { %v1653_v15 = vpop.permute.xlu2 %1652  ;;  %2221 = vmatmul.msk.f32.gmra.mxu1 %vm356_vm3, %v154_v57 }
  0xf6   : > { %v355_v11 = vpop.permute.xlu1 %354  ;;  %v1520_v27 = vpop.permute.xlu2 %1519  ;;  %2222 = vmatmul.msk.f32.gmra.mxu1 %vm356_vm3, %v155_v61 }
  0xf7   : > { %v589_v13 = vpop.permute.xlu0 %588  ;;  %2190 = vmatpush.msk.msra.mxu0 %vm405_vm2, %v355_v11  ;;  %v2079_v11 = vld [vmem:[%s3384_s1 + $0x288] sm:$0xff] }
  0xf8   : > { %2224 = vmatpush.msk.msra.mxu2 %vm405_vm2, %v589_v13  ;;  %2191 = vmatmul.msk.f32.vlgmr.msra.gmra.mxu0 %vm356_vm3, %v2014_v10  ;;  %v2028_v13 = vld [vmem:[%s3384_s1 + $0xf0] sm:$0xff] }
  0xf9   : > { %2225 = vmatmul.msk.f32.vlgmr.msra.gmra.mxu2 %vm356_vm3, %v2030_v12  ;;  %2258 = vmatpush.msk.msrb.mxu0 %vm405_vm2, %v855_v8  ;;  %v2027_v8 = vld [vmem:[%s3384_s1 + $0xe8] sm:$0xff] }
  0xfa   : > { %2292 = vmatpush.msk.msrb.mxu2 %vm405_vm2, %v1121_v6  ;;  %v2078_v6 = vld [vmem:[%s3384_s1 + $0x280] sm:$0xff]  ;;  %v2059_v12 = vld [vmem:[%s3384_s1 + $0x1e8] sm:$0xff] }
  0xfc   : > { %2360 = vmatpush.msk.msra.mxu2 %vm405_vm2, %v1653_v15 }
  0xfe   : > { %v722_v18 = vpop.permute.xlu1 %721  ;;  %2223 = vmatmul.msk.f32.gmra.mxu1 %vm356_vm3, %v156_v1 }
  0xff   : > { %v1254_v20 = vpop.permute.xlu0 %1253  ;;  %2241 = vmatpush.msk.msra.mxu3 %vm405_vm2, %v722_v18  ;;  %v2029_v18 = vld [vmem:[%s3384_s1 + $0xf8] sm:$0xff] }
 0x100   : > { %2192 = vmatmul.msk.f32.gmra.mxu0 %vm356_vm3, %v2015_v16  ;;  %2242 = vmatmul.msk.f32.vlgmr.msra.gmra.mxu3 %vm356_vm3, %v2046_v17  ;;  %v2080_v16 = vld [vmem:[%s3384_s1 + $0x290] sm:$0xff] }
 0x101   : > { %2226 = vmatmul.msk.f32.gmra.mxu2 %vm356_vm3, %v2031_v19  ;;  %2309 = vmatpush.msk.msrb.mxu3 %vm405_vm2, %v1254_v20  ;;  %v2060_v17 = vld [vmem:[%s3384_s1 + $0x1f0] sm:$0xff]  ;;  %v2045_v19 = vld [vmem:[%s3384_s1 + $0x178] sm:$0xff] }
 0x103   : > { %v540_v5 = vpop.f32.mrf.mxu1 }
 0x106   : > { %v988_v23 = vpop.permute.xlu1 %987 }
 0x107   : > { %v1387_v26 = vpop.permute.xlu0 %1386  ;;  %2275 = vmatpush.msk.msrb.mxu1 %vm405_vm2, %v988_v23  ;;  %v2061_v23 = vld [vmem:[%s3384_s1 + $0x1f8] sm:$0xff] }
 0x108   : > { %2326 = vmatpush.msk.msra.mxu0 %vm405_vm2, %v1387_v26  ;;  %2243 = vmatmul.msk.f32.gmra.mxu3 %vm356_vm3, %v2047_v22 }
 0x109   : > { %2193 = vmatmul.msk.f32.gmra.mxu0 %vm356_vm3, %v2016_v24  ;;  %2227 = vmatmul.msk.f32.gmra.mxu2 %vm356_vm3, %v2032_v25  ;;  %v2062_v24 = vld [vmem:[%s3384_s1 + $0x200] sm:$0xff] }
 0x10a   : > { %2343 = vmatpush.msk.msra.mxu1 %vm405_vm2, %v1520_v27  ;;  %v2094_v25 = vld [vmem:[%s3384_s1 + $0x300] sm:$0xff] }
 0x10b   : > { %2276 = vmatmul.msk.f32.vlgmr.msrb.gmra.mxu1 %vm356_vm3, %v2078_v6  ;;  %v543_v10 = vpop.f32.mrf.mxu1  ;;  %v2086_v6 = vld [vmem:[%s3384_s1 + $0x2c0] sm:$0xff] }
 0x10e   : > { %v1786_v30 = vpop.permute.xlu1 %1785 }
 0x10f   : > { %2377 = vmatpush.msk.msra.mxu3 %vm405_vm2, %v1786_v30 }
 0x110   : > { %2244 = vmatmul.msk.f32.gmra.mxu3 %vm356_vm3, %v2048_v29 }
 0x111   : > { %2194 = vmatmul.msk.f32.gmra.mxu0 %vm356_vm3, %v2017_v31  ;;  %2228 = vmatmul.msk.f32.gmra.mxu2 %vm356_vm3, %v2033_v32  ;;  %v2110_v32 = vld [vmem:[%s3384_s1 + $0x380] sm:$0xff] }
 0x113   : > { %2277 = vmatmul.msk.f32.gmra.mxu1 %vm356_vm3, %v2079_v11  ;;  %v546_v15 = vpop.f32.mrf.mxu1  ;;  %v2114_v11 = vld [vmem:[%s3384_s1 + $0x3a0] sm:$0xff] }
 0x118   : > { %2245 = vmatmul.msk.f32.gmra.mxu3 %vm356_vm3, %v2049_v34  ;;  %v2095_v34 = vld [vmem:[%s3384_s1 + $0x308] sm:$0xff] }
 0x119   : > { %2195 = vmatmul.msk.f32.gmra.mxu0 %vm356_vm3, %v2018_v35  ;;  %2229 = vmatmul.msk.f32.gmra.mxu2 %vm356_vm3, %v2034_v36 }
 0x11b   : > { %2278 = vmatmul.msk.f32.gmra.mxu1 %vm356_vm3, %v2080_v16  ;;  %v549_v20 = vpop.f32.mrf.mxu1 }
 0x120   : > { %2246 = vmatmul.msk.f32.gmra.mxu3 %vm356_vm3, %v2050_v38 }
 0x121   : > { %2196 = vmatmul.msk.f32.gmra.mxu0 %vm356_vm3, %v2019_v39  ;;  %2230 = vmatmul.msk.f32.gmra.mxu2 %vm356_vm3, %v2035_v40 }
 0x123   : > { %2279 = vmatmul.msk.f32.gmra.mxu1 %vm356_vm3, %v2081_v21  ;;  %v552_v27 = vpop.f32.mrf.mxu1 }
 0x128   : > { %2247 = vmatmul.msk.f32.gmra.mxu3 %vm356_vm3, %v2051_v42  ;;  %v2111_v42 = vld [vmem:[%s3384_s1 + $0x388] sm:$0xff] }
 0x129   : > { %2197 = vmatmul.msk.f32.gmra.mxu0 %vm356_vm3, %v2020_v43  ;;  %2231 = vmatmul.msk.f32.gmra.mxu2 %vm356_vm3, %v2036_v44  ;;  %v2064_v44 = vld [vmem:[%s3384_s1 + $0x210] sm:$0xff] }
 0x12b   : > { %2280 = vmatmul.msk.f32.gmra.mxu1 %vm356_vm3, %v2082_v28  ;;  %v555_v36 = vpop.f32.mrf.mxu1  ;;  %v2088_v28 = vld [vmem:[%s3384_s1 + $0x2d0] sm:$0xff] }
 0x130   : > { %2248 = vmatmul.msk.f32.gmra.mxu3 %vm356_vm3, %v2052_v46 }
 0x131   : > { %2198 = vmatmul.msk.f32.gmra.mxu0 %vm356_vm3, %v2021_v47  ;;  %2232 = vmatmul.msk.f32.gmra.mxu2 %vm356_vm3, %v2037_v48  ;;  %v2084_v48 = vld [vmem:[%s3384_s1 + $0x2b0] sm:$0xff] }
 0x133   : > { %2281 = vmatmul.msk.f32.gmra.mxu1 %vm356_vm3, %v2083_v37  ;;  %v558_v47 = vpop.f32.mrf.mxu1 }
 0x138   : > { %2249 = vmatmul.msk.f32.gmra.mxu3 %vm356_vm3, %v2053_v50 }
 0x139   : > { %2199 = vmatmul.msk.f32.gmra.mxu0 %vm356_vm3, %v2022_v51  ;;  %2233 = vmatmul.msk.f32.gmra.mxu2 %vm356_vm3, %v2038_v52 }
 0x13b   : > { %2282 = vmatmul.msk.f32.gmra.mxu1 %vm356_vm3, %v2084_v48  ;;  %v2102_v48 = vld [vmem:[%s3384_s1 + $0x340] sm:$0xff] }
 0x140   : > { %2250 = vmatmul.msk.f32.gmra.mxu3 %vm356_vm3, %v2054_v54 }
 0x141   : > { %2200 = vmatmul.msk.f32.gmra.mxu0 %vm356_vm3, %v2023_v55  ;;  %2234 = vmatmul.msk.f32.gmra.mxu2 %vm356_vm3, %v2039_v56  ;;  %v2065_v55 = vld [vmem:[%s3384_s1 + $0x218] sm:$0xff] }
 0x142   : > { %v2097_v56 = vld [vmem:[%s3384_s1 + $0x318] sm:$0xff] }
 0x148   : > { %2251 = vmatmul.msk.f32.gmra.mxu3 %vm356_vm3, %v2055_v58  ;;  %v561_v58 = vpop.f32.mrf.mxu1 }
 0x149   : > { %2201 = vmatmul.msk.f32.gmra.mxu0 %vm356_vm3, %v2024_v59  ;;  %2235 = vmatmul.msk.f32.gmra.mxu2 %vm356_vm3, %v2040_v60  ;;  %v2085_v59 = vld [vmem:[%s3384_s1 + $0x2b8] sm:$0xff] }
 0x14a   : > { %2283 = vmatmul.msk.f32.gmra.mxu1 %vm356_vm3, %v2085_v59  ;;  %v2071_v59 = vld [vmem:[%s3384_s1 + $0x248] sm:$0xff] }
 0x150   : > { %2252 = vmatmul.msk.f32.gmra.mxu3 %vm356_vm3, %v2056_v62 }
 0x151   : > { %2202 = vmatmul.msk.f32.gmra.mxu0 %vm356_vm3, %v2025_v63  ;;  %2236 = vmatmul.msk.f32.gmra.mxu2 %vm356_vm3, %v2041_v0  ;;  %v2113_v0 = vld [vmem:[%s3384_s1 + $0x398] sm:$0xff] }
 0x152   : > { %2284 = vmatmul.msk.f32.gmra.mxu1 %vm356_vm3, %v2086_v6 }
 0x158   : > { %2253 = vmatmul.msk.f32.gmra.mxu3 %vm356_vm3, %v2057_v2  ;;  %v2066_v2 = vld [vmem:[%s3384_s1 + $0x220] sm:$0xff] }
 0x159   : > { %2203 = vmatmul.msk.f32.gmra.mxu0 %vm356_vm3, %v2026_v3  ;;  %2237 = vmatmul.msk.f32.gmra.mxu2 %vm356_vm3, %v2042_v4  ;;  %v2098_v3 = vld [vmem:[%s3384_s1 + $0x320] sm:$0xff] }
 0x160   : > { %2254 = vmatmul.msk.f32.gmra.mxu3 %vm356_vm3, %v2058_v7 }
 0x161   : > { %2204 = vmatmul.msk.f32.gmra.mxu0 %vm356_vm3, %v2027_v8  ;;  %2238 = vmatmul.msk.f32.gmra.mxu2 %vm356_vm3, %v2043_v9 }
 0x168   : > { %2255 = vmatmul.msk.f32.gmra.mxu3 %vm356_vm3, %v2059_v12 }
 0x169   : > { %2205 = vmatmul.msk.f32.gmra.mxu0 %vm356_vm3, %v2028_v13  ;;  %2239 = vmatmul.msk.f32.gmra.mxu2 %vm356_vm3, %v2044_v14  ;;  %v2067_v13 = vld [vmem:[%s3384_s1 + $0x228] sm:$0xff] }
 0x16a   : > { %v2099_v14 = vld [vmem:[%s3384_s1 + $0x328] sm:$0xff] }
 0x170   : > { %2256 = vmatmul.msk.f32.gmra.mxu3 %vm356_vm3, %v2060_v17  ;;  %v2087_v17 = vld [vmem:[%s3384_s1 + $0x2c8] sm:$0xff] }
 0x171   : > { %2206 = vmatmul.msk.f32.gmra.mxu0 %vm356_vm3, %v2029_v18  ;;  %2240 = vmatmul.msk.f32.gmra.mxu2 %vm356_vm3, %v2045_v19 }
 0x172   : > { %2285 = vmatmul.msk.f32.gmra.mxu1 %vm356_vm3, %v2087_v17  ;;  %v2120_v17 = vld [vmem:[%s3384_s1 + $0x3d0] sm:$0xff] }
 0x175   : > { %v425_v22 = vpop.f32.mrf.mxu0 }
 0x176   : > { %v541_v26 = vadd.f32 %v540_v5, %v425_v22  ;;  %v564_v5 = vpop.f32.mrf.mxu1  ;;  %v2115_v22 = vld [vmem:[%s3384_s1 + $0x3a8] sm:$0xff] }
 0x178   : > { %2257 = vmatmul.msk.f32.gmra.mxu3 %vm356_vm3, %v2061_v23 }
 0x179   : > { %2259 = vmatmul.msk.f32.vlgmr.msrb.gmra.mxu0 %vm356_vm3, %v2062_v24  ;;  %2293 = vmatmul.msk.f32.vlgmr.msrb.gmra.mxu2 %vm356_vm3, %v2094_v25  ;;  %v2068_v24 = vld [vmem:[%s3384_s1 + $0x230] sm:$0xff] }
 0x17a   : > { %v2100_v25 = vld [vmem:[%s3384_s1 + $0x330] sm:$0xff]  ;;  %2286 = vmatmul.msk.f32.gmra.mxu1 %vm356_vm3, %v2088_v28 }
 0x17c   : > { %v657_v29 = vpop.f32.mrf.mxu2 }
 0x17d   : > { %v705_v30 = vadd.f32 %v657_v29, %v541_v26  ;;  %v428_v31 = vpop.f32.mrf.mxu0 }
 0x17e   : > { %v544_v35 = vadd.f32 %v543_v10, %v428_v31  ;;  %v567_v16 = vpop.f32.mrf.mxu1 }
 0x180   : > { %2310 = vmatmul.msk.f32.vlgmr.msrb.gmra.mxu3 %vm356_vm3, %v2110_v32 }
 0x181   : > { %2260 = vmatmul.msk.f32.gmra.mxu0 %vm356_vm3, %v2063_v33  ;;  %2294 = vmatmul.msk.f32.gmra.mxu2 %vm356_vm3, %v2095_v34  ;;  %v2116_v33 = vld [vmem:[%s3384_s1 + $0x3b0] sm:$0xff] }
 0x183   : > { %v790_v38 = vpop.f32.mrf.mxu3 }
 0x184   : > { %v660_v39 = vpop.f32.mrf.mxu2  ;;  %v2777_v40 = vadd.f32 %v790_v38, %v705_v30 }
 0x185   : > { %v706_v41 = vadd.f32 %v660_v39, %v544_v35  ;;  %v2069_v35 = vld [vmem:[%s3384_s1 + $0x238] sm:$0xff] }
 0x186   : > { %v431_v43 = vpop.f32.mrf.mxu0  ;;  %v2089_v39 = vld [vmem:[%s3384_s1 + $0x2d8] sm:$0xff] }
 0x187   : > { %v547_v46 = vadd.f32 %v546_v15, %v431_v43  ;;  %2287 = vmatmul.msk.f32.gmra.mxu1 %vm356_vm3, %v2089_v39 }
 0x188   : > { %2311 = vmatmul.msk.f32.gmra.mxu3 %vm356_vm3, %v2111_v42 }
 0x189   : > { %2261 = vmatmul.msk.f32.gmra.mxu0 %vm356_vm3, %v2064_v44  ;;  %2295 = vmatmul.msk.f32.gmra.mxu2 %vm356_vm3, %v2096_v45  ;;  %v2117_v45 = vld [vmem:[%s3384_s1 + $0x3b8] sm:$0xff] }
 0x18b   : > { %v793_v49 = vpop.f32.mrf.mxu3 }
 0x18c   : > { %v663_v50 = vpop.f32.mrf.mxu2  ;;  %v2795_v51 = vadd.f32 %v793_v49, %v706_v41 }
 0x18d   : > { %v707_v52 = vadd.f32 %v663_v50, %v547_v46 }
 0x18e   : > { %v434_v54 = vpop.f32.mrf.mxu0 }
 0x18f   : > { %v550_v57 = vadd.f32 %v549_v20, %v434_v54 }
 0x190   : > { %2312 = vmatmul.msk.f32.gmra.mxu3 %vm356_vm3, %v2112_v53 }
 0x191   : > { %2262 = vmatmul.msk.f32.gmra.mxu0 %vm356_vm3, %v2065_v55  ;;  %2296 = vmatmul.msk.f32.gmra.mxu2 %vm356_vm3, %v2097_v56 }
 0x193   : > { %v796_v60 = vpop.f32.mrf.mxu3 }
 0x194   : > { %v666_v61 = vpop.f32.mrf.mxu2  ;;  %v2813_v62 = vadd.f32 %v796_v60, %v707_v52  ;;  %v2090_v52 = vld [vmem:[%s3384_s1 + $0x2e0] sm:$0xff]  ;;  %v2103_v60 = vld [vmem:[%s3384_s1 + $0x348] sm:$0xff] }
 0x195   : > { %v708_v63 = vadd.f32 %v666_v61, %v550_v57  ;;  %2288 = vmatmul.msk.f32.gmra.mxu1 %vm356_vm3, %v2090_v52  ;;  %v2118_v57 = vld [vmem:[%s3384_s1 + $0x3c0] sm:$0xff] }
 0x196   : > { %v437_v1 = vpop.f32.mrf.mxu0 }
 0x197   : > { %v553_v4 = vadd.f32 %v552_v27, %v437_v1  ;;  %v570_v27 = vpop.f32.mrf.mxu1 }
 0x198   : > { %2313 = vmatmul.msk.f32.gmra.mxu3 %vm356_vm3, %v2113_v0  ;;  %v2091_v0 = vld [vmem:[%s3384_s1 + $0x2e8] sm:$0xff] }
 0x199   : > { %2263 = vmatmul.msk.f32.gmra.mxu0 %vm356_vm3, %v2066_v2  ;;  %2297 = vmatmul.msk.f32.gmra.mxu2 %vm356_vm3, %v2098_v3 }
 0x19b   : > { %v799_v7 = vpop.f32.mrf.mxu3 }
 0x19c   : > { %v669_v8 = vpop.f32.mrf.mxu2  ;;  %v2831_v9 = vadd.f32 %v799_v7, %v708_v63  ;;  %v2072_v7 = vld [vmem:[%s3384_s1 + $0x250] sm:$0xff] }
 0x19d   : > { %v709_v10 = vadd.f32 %v669_v8, %v553_v4  ;;  %2289 = vmatmul.msk.f32.gmra.mxu1 %vm356_vm3, %v2091_v0  ;;  %v2104_v8 = vld [vmem:[%s3384_s1 + $0x350] sm:$0xff] }
 0x19e   : > { %v440_v12 = vpop.f32.mrf.mxu0 }
 0x19f   : > { %v556_v15 = vadd.f32 %v555_v36, %v440_v12  ;;  %v2101_v36 = vld [vmem:[%s3384_s1 + $0x338] sm:$0xff]  ;;  %v573_v38 = vpop.f32.mrf.mxu1  ;;  %v2092_v12 = vld [vmem:[%s3384_s1 + $0x2f0] sm:$0xff] }
 0x1a0   : > { %2314 = vmatmul.msk.f32.gmra.mxu3 %vm356_vm3, %v2114_v11 }
 0x1a1   : > { %2264 = vmatmul.msk.f32.gmra.mxu0 %vm356_vm3, %v2067_v13  ;;  %2298 = vmatmul.msk.f32.gmra.mxu2 %vm356_vm3, %v2099_v14 }
 0x1a3   : > { %v802_v18 = vpop.f32.mrf.mxu3 }
 0x1a4   : > { %v672_v19 = vpop.f32.mrf.mxu2  ;;  %v2849_v20 = vadd.f32 %v802_v18, %v709_v10 }
 0x1a5   : > { %v710_v21 = vadd.f32 %v672_v19, %v556_v15  ;;  %2290 = vmatmul.msk.f32.gmra.mxu1 %vm356_vm3, %v2092_v12  ;;  %v2073_v19 = vld [vmem:[%s3384_s1 + $0x258] sm:$0xff] }
 0x1a6   : > { %v443_v23 = vpop.f32.mrf.mxu0  ;;  %v2145_v12 = vld [vmem:[%s3384_s1 + $0x498] sm:$0xff] }
 0x1a7   : > { %v559_v26 = vadd.f32 %v558_v47, %v443_v23  ;;  %v2070_v47 = vld [vmem:[%s3384_s1 + $0x240] sm:$0xff]  ;;  %v576_v50 = vpop.f32.mrf.mxu1 }
 0x1a8   : > { %2315 = vmatmul.msk.f32.gmra.mxu3 %vm356_vm3, %v2115_v22 }
 0x1a9   : > { %2265 = vmatmul.msk.f32.gmra.mxu0 %vm356_vm3, %v2068_v24  ;;  %2299 = vmatmul.msk.f32.gmra.mxu2 %vm356_vm3, %v2100_v25  ;;  %v2093_v24 = vld [vmem:[%s3384_s1 + $0x2f8] sm:$0xff] }
 0x1ab   : > { %v805_v29 = vpop.f32.mrf.mxu3 }
 0x1ac   : > { %v675_v30 = vpop.f32.mrf.mxu2  ;;  %v2867_v31 = vadd.f32 %v805_v29, %v710_v21  ;;  %v2105_v21 = vld [vmem:[%s3384_s1 + $0x358] sm:$0xff] }
 0x1ad   : > { %v711_v32 = vadd.f32 %v675_v30, %v559_v26  ;;  %2291 = vmatmul.msk.f32.gmra.mxu1 %vm356_vm3, %v2093_v24  ;;  %v2121_v29 = vld [vmem:[%s3384_s1 + $0x3d8] sm:$0xff] }
 0x1ae   : > { %v446_v34 = vpop.f32.mrf.mxu0 }
 0x1af   : > { %v562_v37 = vadd.f32 %v561_v58, %v446_v34  ;;  %v579_v63 = vpop.f32.mrf.mxu1 }
 0x1b0   : > { %2316 = vmatmul.msk.f32.gmra.mxu3 %vm356_vm3, %v2116_v33  ;;  %v2106_v33 = vld [vmem:[%s3384_s1 + $0x360] sm:$0xff] }
 0x1b1   : > { %2266 = vmatmul.msk.f32.gmra.mxu0 %vm356_vm3, %v2069_v35  ;;  %2300 = vmatmul.msk.f32.gmra.mxu2 %vm356_vm3, %v2101_v36  ;;  %v2142_v36 = vld [vmem:[%s3384_s1 + $0x480] sm:$0xff] }
 0x1b3   : > { %v808_v41 = vpop.f32.mrf.mxu3 }
 0x1b4   : > { %v678_v42 = vpop.f32.mrf.mxu2  ;;  %v2885_v43 = vadd.f32 %v808_v41, %v711_v32  ;;  %v2074_v32 = vld [vmem:[%s3384_s1 + $0x260] sm:$0xff] }
 0x1b5   : > { %v712_v44 = vadd.f32 %v678_v42, %v562_v37  ;;  %2344 = vmatmul.msk.f32.vlgmr.msra.gmra.mxu1 %vm356_vm3, %v2142_v36  ;;  %v2122_v42 = vld [vmem:[%s3384_s1 + $0x3e0] sm:$0xff] }
 0x1b6   : > { %v449_v46 = vpop.f32.mrf.mxu0 }
 0x1b7   : > { %v565_v49 = vadd.f32 %v564_v5, %v449_v46  ;;  %v2119_v5 = vld [vmem:[%s3384_s1 + $0x3c8] sm:$0xff]  ;;  %v582_v11 = vpop.f32.mrf.mxu1 }
 0x1b8   : > { %2317 = vmatmul.msk.f32.gmra.mxu3 %vm356_vm3, %v2117_v45  ;;  %v2075_v45 = vld [vmem:[%s3384_s1 + $0x268] sm:$0xff] }
 0x1b9   : > { %2267 = vmatmul.msk.f32.gmra.mxu0 %vm356_vm3, %v2070_v47  ;;  %2301 = vmatmul.msk.f32.gmra.mxu2 %vm356_vm3, %v2102_v48  ;;  %v2107_v46 = vld [vmem:[%s3384_s1 + $0x368] sm:$0xff] }
 0x1bb   : > { %v811_v53 = vpop.f32.mrf.mxu3 }
 0x1bc   : > { %v681_v54 = vpop.f32.mrf.mxu2  ;;  %v2903_v55 = vadd.f32 %v811_v53, %v712_v44 }
 0x1bd   : > { %v713_v56 = vadd.f32 %v681_v54, %v565_v49  ;;  %v2143_v49 = vld [vmem:[%s3384_s1 + $0x488] sm:$0xff] }
 0x1be   : > { %v452_v58 = vpop.f32.mrf.mxu0  ;;  %2345 = vmatmul.msk.f32.gmra.mxu1 %vm356_vm3, %v2143_v49  ;;  %v2160_v49 = vld [vmem:[%s3384_s1 + $0x510] sm:$0xff] }
 0x1bf   : > { %v568_v61 = vadd.f32 %v567_v16, %v452_v58  ;;  %v585_v23 = vpop.f32.mrf.mxu1  ;;  %v2076_v58 = vld [vmem:[%s3384_s1 + $0x270] sm:$0xff] }
 0x1c0   : > { %2318 = vmatmul.msk.f32.gmra.mxu3 %vm356_vm3, %v2118_v57 }
 0x1c1   : > { %2268 = vmatmul.msk.f32.gmra.mxu0 %vm356_vm3, %v2071_v59  ;;  %2302 = vmatmul.msk.f32.gmra.mxu2 %vm356_vm3, %v2103_v60  ;;  %v2108_v59 = vld [vmem:[%s3384_s1 + $0x370] sm:$0xff] }
 0x1c3   : > { %v814_v1 = vpop.f32.mrf.mxu3 }
 0x1c4   : > { %v684_v2 = vpop.f32.mrf.mxu2  ;;  %v2921_v3 = vadd.f32 %v814_v1, %v713_v56  ;;  %v2123_v56 = vld [vmem:[%s3384_s1 + $0x3e8] sm:$0xff] }
 0x1c5   : > { %v714_v4 = vadd.f32 %v684_v2, %v568_v61 }
 0x1c6   : > { %v455_v6 = vpop.f32.mrf.mxu0 }
 0x1c7   : > { %v571_v10 = vadd.f32 %v570_v27, %v455_v6  ;;  %v1056_v35 = vpop.f32.mrf.mxu1 }
 0x1c8   : > { %2319 = vmatmul.msk.f32.gmra.mxu3 %vm356_vm3, %v2119_v5  ;;  %v2124_v5 = vld [vmem:[%s3384_s1 + $0x3f0] sm:$0xff] }
 0x1c9   : > { %2269 = vmatmul.msk.f32.gmra.mxu0 %vm356_vm3, %v2072_v7  ;;  %2303 = vmatmul.msk.f32.gmra.mxu2 %vm356_vm3, %v2104_v8  ;;  %v2077_v7 = vld [vmem:[%s3384_s1 + $0x278] sm:$0xff] }
 0x1ca   : > { %v2109_v8 = vld [vmem:[%s3384_s1 + $0x378] sm:$0xff] }
 0x1cb   : > { %v817_v13 = vpop.f32.mrf.mxu3 }
 0x1cc   : > { %v687_v14 = vpop.f32.mrf.mxu2  ;;  %v2939_v15 = vadd.f32 %v817_v13, %v714_v4 }
 0x1cd   : > { %v715_v16 = vadd.f32 %v687_v14, %v571_v10 }
 0x1ce   : > { %v458_v18 = vpop.f32.mrf.mxu0 }
 0x1cf   : > { %v574_v22 = vadd.f32 %v573_v38, %v458_v18  ;;  %v1059_v48 = vpop.f32.mrf.mxu1  ;;  %v2125_v18 = vld [vmem:[%s3384_s1 + $0x3f8] sm:$0xff] }
 0x1d0   : > { %2320 = vmatmul.msk.f32.gmra.mxu3 %vm356_vm3, %v2120_v17 }
 0x1d1   : > { %2270 = vmatmul.msk.f32.gmra.mxu0 %vm356_vm3, %v2073_v19  ;;  %2304 = vmatmul.msk.f32.gmra.mxu2 %vm356_vm3, %v2105_v21  ;;  %v2126_v21 = vld [vmem:[%s3384_s1 + $0x400] sm:$0xff] }
 0x1d3   : > { %v820_v25 = vpop.f32.mrf.mxu3 }
 0x1d4   : > { %v690_v26 = vpop.f32.mrf.mxu2  ;;  %v2957_v27 = vadd.f32 %v820_v25, %v715_v16 }
 0x1d5   : > { %v716_v28 = vadd.f32 %v690_v26, %v574_v22  ;;  %v2158_v22 = vld [vmem:[%s3384_s1 + $0x500] sm:$0xff] }
 0x1d6   : > { %v461_v30 = vpop.f32.mrf.mxu0  ;;  %v2146_v26 = vld [vmem:[%s3384_s1 + $0x4a0] sm:$0xff] }
 0x1d7   : > { %v577_v34 = vadd.f32 %v576_v50, %v461_v30  ;;  %v1062_v61 = vpop.f32.mrf.mxu1 }
 0x1d8   : > { %2321 = vmatmul.msk.f32.gmra.mxu3 %vm356_vm3, %v2121_v29 }
 0x1d9   : > { %2271 = vmatmul.msk.f32.gmra.mxu0 %vm356_vm3, %v2074_v32  ;;  %2305 = vmatmul.msk.f32.gmra.mxu2 %vm356_vm3, %v2106_v33 }
 0x1db   : > { %v823_v37 = vpop.f32.mrf.mxu3 }
 0x1dc   : > { %v693_v38 = vpop.f32.mrf.mxu2  ;;  %v2975_v39 = vadd.f32 %v823_v37, %v716_v28 }
 0x1dd   : > { %v717_v41 = vadd.f32 %v693_v38, %v577_v34  ;;  %v2127_v34 = vld [vmem:[%s3384_s1 + $0x408] sm:$0xff] }
 0x1de   : > { %v464_v44 = vpop.f32.mrf.mxu0 }
 0x1df   : > { %v580_v47 = vadd.f32 %v579_v63, %v464_v44  ;;  %v2144_v63 = vld [vmem:[%s3384_s1 + $0x490] sm:$0xff] }
 0x1e0   : > { %2322 = vmatmul.msk.f32.gmra.mxu3 %vm356_vm3, %v2122_v42  ;;  %2346 = vmatmul.msk.f32.gmra.mxu1 %vm356_vm3, %v2144_v63  ;;  %v2129_v63 = vld [vmem:[%s3384_s1 + $0x418] sm:$0xff] }
 0x1e1   : > { %2272 = vmatmul.msk.f32.gmra.mxu0 %vm356_vm3, %v2075_v45  ;;  %2306 = vmatmul.msk.f32.gmra.mxu2 %vm356_vm3, %v2107_v46 }
 0x1e3   : > { %v826_v50 = vpop.f32.mrf.mxu3 }
 0x1e4   : > { %v696_v52 = vpop.f32.mrf.mxu2  ;;  %v2993_v53 = vadd.f32 %v826_v50, %v717_v41  ;;  %v2147_v41 = vld [vmem:[%s3384_s1 + $0x4a8] sm:$0xff] }
 0x1e5   : > { %v718_v54 = vadd.f32 %v696_v52, %v580_v47 }
 0x1e6   : > { %v467_v57 = vpop.f32.mrf.mxu0 }
 0x1e7   : > { %v583_v60 = vadd.f32 %v582_v11, %v467_v57  ;;  %v1065_v11 = vpop.f32.mrf.mxu1 }
 0x1e8   : > { %2323 = vmatmul.msk.f32.gmra.mxu3 %vm356_vm3, %v2123_v56  ;;  %2347 = vmatmul.msk.f32.gmra.mxu1 %vm356_vm3, %v2145_v12  ;;  %v2148_v56 = vld [vmem:[%s3384_s1 + $0x4b0] sm:$0xff] }
 0x1e9   : > { %2273 = vmatmul.msk.f32.gmra.mxu0 %vm356_vm3, %v2076_v58  ;;  %2307 = vmatmul.msk.f32.gmra.mxu2 %vm356_vm3, %v2108_v59 }
 0x1eb   : > { %v829_v0 = vpop.f32.mrf.mxu3 }
 0x1ec   : > { %v699_v1 = vpop.f32.mrf.mxu2  ;;  %v3011_v2 = vadd.f32 %v829_v0, %v718_v54  ;;  %v2161_v0 = vld [vmem:[%s3384_s1 + $0x518] sm:$0xff] }
 0x1ed   : > { %v719_v4 = vadd.f32 %v699_v1, %v583_v60 }
 0x1ee   : > { %v470_v6 = vpop.f32.mrf.mxu0 }
 0x1ef   : > { %v586_v10 = vadd.f32 %v585_v23, %v470_v6  ;;  %v1068_v25 = vpop.f32.mrf.mxu1  ;;  %v2149_v6 = vld [vmem:[%s3384_s1 + $0x4b8] sm:$0xff] }
 0x1f0   : > { %2324 = vmatmul.msk.f32.gmra.mxu3 %vm356_vm3, %v2124_v5  ;;  %2348 = vmatmul.msk.f32.gmra.mxu1 %vm356_vm3, %v2146_v26 }
 0x1f1   : > { %2274 = vmatmul.msk.f32.gmra.mxu0 %vm356_vm3, %v2077_v7  ;;  %2308 = vmatmul.msk.f32.gmra.mxu2 %vm356_vm3, %v2109_v8 }
 0x1f3   : > { %v832_v13 = vpop.f32.mrf.mxu3 }
 0x1f4   : > { %v702_v14 = vpop.f32.mrf.mxu2  ;;  %v3029_v16 = vadd.f32 %v832_v13, %v719_v4  ;;  %v2130_v13 = vld [vmem:[%s3384_s1 + $0x420] sm:$0xff] }
 0x1f5   : > { %v720_v17 = vadd.f32 %v702_v14, %v586_v10  ;;  %v2162_v14 = vld [vmem:[%s3384_s1 + $0x520] sm:$0xff] }
 0x1f6   : > { %v923_v19 = vpop.f32.mrf.mxu0 }
 0x1f7   : > { %v971_v23 = vadd.f32 %v923_v19, %v2777_v40  ;;  %v2174_v40 = vld [vmem:[%s3384_s1 + $0x580] sm:$0xff]  ;;  %v1071_v38 = vpop.f32.mrf.mxu1 }
 0x1f8   : > { %2325 = vmatmul.msk.f32.gmra.mxu3 %vm356_vm3, %v2125_v18  ;;  %2349 = vmatmul.msk.f32.gmra.mxu1 %vm356_vm3, %v2147_v41 }
 0x1f9   : > { %v1104_v24 = vadd.f32 %v1056_v35, %v971_v23  ;;  %2327 = vmatmul.msk.f32.vlgmr.msra.gmra.mxu0 %vm356_vm3, %v2126_v21  ;;  %2361 = vmatmul.msk.f32.vlgmr.msra.gmra.mxu2 %vm356_vm3, %v2158_v22  ;;  %v2159_v35 = vld [vmem:[%s3384_s1 + $0x508] sm:$0xff]  ;;  %v2150_v21 = vld [vmem:[%s3384_s1 + $0x4c0] sm:$0xff] }
 0x1fb   : > { %v835_v28 = vpop.f32.mrf.mxu3 }
 0x1fc   : > { %v3048_v29 = vadd.f32 %v835_v28, %v720_v17  ;;  %v1189_v30 = vpop.f32.mrf.mxu2  ;;  %v2131_v28 = vld [vmem:[%s3384_s1 + $0x428] sm:$0xff] }
 0x1fd   : > { %v1237_v32 = vadd.f32 %v1189_v30, %v1104_v24  ;;  %v2163_v30 = vld [vmem:[%s3384_s1 + $0x528] sm:$0xff] }
 0x1fe   : > { %v926_v33 = vpop.f32.mrf.mxu0 }
 0x1ff   : > { %v972_v36 = vadd.f32 %v926_v33, %v2795_v51  ;;  %v2175_v51 = vld [vmem:[%s3384_s1 + $0x588] sm:$0xff]  ;;  %v1074_v54 = vpop.f32.mrf.mxu1 }
 0x200   : > { %2378 = vmatmul.msk.f32.vlgmr.msra.gmra.mxu3 %vm356_vm3, %v2174_v40  ;;  %2350 = vmatmul.msk.f32.gmra.mxu1 %vm356_vm3, %v2148_v56 }
 0x201   : > { %v1105_v37 = vadd.f32 %v1059_v48, %v972_v36  ;;  %2328 = vmatmul.msk.f32.gmra.mxu0 %vm356_vm3, %v2127_v34  ;;  %2362 = vmatmul.msk.f32.gmra.mxu2 %vm356_vm3, %v2159_v35  ;;  %v2128_v48 = vld [vmem:[%s3384_s1 + $0x410] sm:$0xff]  ;;  %v2151_v34 = vld [vmem:[%s3384_s1 + $0x4c8] sm:$0xff] }
 0x203   : > { %v1322_v42 = vpop.f32.mrf.mxu3 }
 0x204   : > { %v1192_v44 = vpop.f32.mrf.mxu2  ;;  %v3067_v45 = vadd.f32 %v1322_v42, %v1237_v32  ;;  %v2132_v42 = vld [vmem:[%s3384_s1 + $0x430] sm:$0xff] }
 0x205   : > { %v1238_v46 = vadd.f32 %v1192_v44, %v1105_v37  ;;  %v2164_v44 = vld [vmem:[%s3384_s1 + $0x530] sm:$0xff] }
 0x206   : > { %v929_v47 = vpop.f32.mrf.mxu0 }
 0x207   : > { %v973_v50 = vadd.f32 %v929_v47, %v2813_v62  ;;  %v2176_v62 = vld [vmem:[%s3384_s1 + $0x590] sm:$0xff]  ;;  %v1077_v5 = vpop.f32.mrf.mxu1 }
 0x208   : > { %2379 = vmatmul.msk.f32.gmra.mxu3 %vm356_vm3, %v2175_v51  ;;  %2351 = vmatmul.msk.f32.gmra.mxu1 %vm356_vm3, %v2149_v6 }
 0x209   : > { %v1106_v52 = vadd.f32 %v1062_v61, %v973_v50  ;;  %2329 = vmatmul.msk.f32.gmra.mxu0 %vm356_vm3, %v2128_v48  ;;  %2363 = vmatmul.msk.f32.gmra.mxu2 %vm356_vm3, %v2160_v49  ;;  %v2152_v48 = vld [vmem:[%s3384_s1 + $0x4d0] sm:$0xff] }
 0x20b   : > { %v1325_v57 = vpop.f32.mrf.mxu3 }
 0x20c   : > { %v1195_v58 = vpop.f32.mrf.mxu2  ;;  %v3086_v59 = vadd.f32 %v1325_v57, %v1238_v46  ;;  %v2133_v57 = vld [vmem:[%s3384_s1 + $0x438] sm:$0xff] }
 0x20d   : > { %v1239_v60 = vadd.f32 %v1195_v58, %v1106_v52  ;;  %v2165_v58 = vld [vmem:[%s3384_s1 + $0x538] sm:$0xff] }
 0x20e   : > { %v932_v61 = vpop.f32.mrf.mxu0 }
 0x20f   : > { %v974_v1 = vadd.f32 %v932_v61, %v2831_v9  ;;  %v2177_v9 = vld [vmem:[%s3384_s1 + $0x598] sm:$0xff]  ;;  %v1080_v19 = vpop.f32.mrf.mxu1 }
 0x210   : > { %2380 = vmatmul.msk.f32.gmra.mxu3 %vm356_vm3, %v2176_v62  ;;  %2352 = vmatmul.msk.f32.gmra.mxu1 %vm356_vm3, %v2150_v21 }
 0x211   : > { %v1107_v4 = vadd.f32 %v1065_v11, %v974_v1  ;;  %2330 = vmatmul.msk.f32.gmra.mxu0 %vm356_vm3, %v2129_v63  ;;  %2364 = vmatmul.msk.f32.gmra.mxu2 %vm356_vm3, %v2161_v0  ;;  %v2153_v63 = vld [vmem:[%s3384_s1 + $0x4d8] sm:$0xff] }
 0x213   : > { %v1328_v7 = vpop.f32.mrf.mxu3 }
 0x214   : > { %v1198_v8 = vpop.f32.mrf.mxu2  ;;  %v3105_v10 = vadd.f32 %v1328_v7, %v1239_v60  ;;  %v2134_v7 = vld [vmem:[%s3384_s1 + $0x440] sm:$0xff] }
 0x215   : > { %v1240_v12 = vadd.f32 %v1198_v8, %v1107_v4  ;;  %v2166_v8 = vld [vmem:[%s3384_s1 + $0x540] sm:$0xff] }
 0x216   : > { %v935_v11 = vpop.f32.mrf.mxu0 }
 0x217   : > { %v975_v17 = vadd.f32 %v935_v11, %v2849_v20  ;;  %v2178_v20 = vld [vmem:[%s3384_s1 + $0x5a0] sm:$0xff]  ;;  %v1083_v33 = vpop.f32.mrf.mxu1 }
 0x218   : > { %2381 = vmatmul.msk.f32.gmra.mxu3 %vm356_vm3, %v2177_v9  ;;  %2353 = vmatmul.msk.f32.gmra.mxu1 %vm356_vm3, %v2151_v34 }
 0x219   : > { %v1108_v18 = vadd.f32 %v1068_v25, %v975_v17  ;;  %2331 = vmatmul.msk.f32.gmra.mxu0 %vm356_vm3, %v2130_v13  ;;  %2365 = vmatmul.msk.f32.gmra.mxu2 %vm356_vm3, %v2162_v14  ;;  %v2154_v13 = vld [vmem:[%s3384_s1 + $0x4e0] sm:$0xff] }
 0x21b   : > { %v1331_v22 = vpop.f32.mrf.mxu3 }
 0x21c   : > { %v1201_v23 = vpop.f32.mrf.mxu2  ;;  %v3124_v24 = vadd.f32 %v1331_v22, %v1240_v12  ;;  %v2135_v22 = vld [vmem:[%s3384_s1 + $0x448] sm:$0xff] }
 0x21d   : > { %v1241_v26 = vadd.f32 %v1201_v23, %v1108_v18  ;;  %v2167_v23 = vld [vmem:[%s3384_s1 + $0x548] sm:$0xff] }
 0x21e   : > { %v938_v25 = vpop.f32.mrf.mxu0 }
 0x21f   : > { %v976_v32 = vadd.f32 %v938_v25, %v2867_v31  ;;  %v2179_v31 = vld [vmem:[%s3384_s1 + $0x5a8] sm:$0xff]  ;;  %v1086_v47 = vpop.f32.mrf.mxu1 }
 0x220   : > { %2382 = vmatmul.msk.f32.gmra.mxu3 %vm356_vm3, %v2178_v20  ;;  %2354 = vmatmul.msk.f32.gmra.mxu1 %vm356_vm3, %v2152_v48 }
 0x221   : > { %v1109_v40 = vadd.f32 %v1071_v38, %v976_v32  ;;  %2332 = vmatmul.msk.f32.gmra.mxu0 %vm356_vm3, %v2131_v28  ;;  %2366 = vmatmul.msk.f32.gmra.mxu2 %vm356_vm3, %v2163_v30  ;;  %v2155_v28 = vld [vmem:[%s3384_s1 + $0x4e8] sm:$0xff] }
 0x223   : > { %v1334_v35 = vpop.f32.mrf.mxu3 }
 0x224   : > { %v1204_v36 = vpop.f32.mrf.mxu2  ;;  %v3143_v37 = vadd.f32 %v1334_v35, %v1241_v26  ;;  %v2136_v35 = vld [vmem:[%s3384_s1 + $0x450] sm:$0xff] }
 0x225   : > { %v1242_v41 = vadd.f32 %v1204_v36, %v1109_v40  ;;  %v2168_v36 = vld [vmem:[%s3384_s1 + $0x550] sm:$0xff] }
 0x226   : > { %v941_v38 = vpop.f32.mrf.mxu0 }
 0x227   : > { %v977_v46 = vadd.f32 %v941_v38, %v2885_v43  ;;  %v2180_v43 = vld [vmem:[%s3384_s1 + $0x5b0] sm:$0xff]  ;;  %v1089_v61 = vpop.f32.mrf.mxu1 }
 0x228   : > { %2383 = vmatmul.msk.f32.gmra.mxu3 %vm356_vm3, %v2179_v31  ;;  %2355 = vmatmul.msk.f32.gmra.mxu1 %vm356_vm3, %v2153_v63  ;;  %v2156_v38 = vld [vmem:[%s3384_s1 + $0x4f0] sm:$0xff] }
 0x229   : > { %v1110_v51 = vadd.f32 %v1074_v54, %v977_v46  ;;  %2333 = vmatmul.msk.f32.gmra.mxu0 %vm356_vm3, %v2132_v42  ;;  %2367 = vmatmul.msk.f32.gmra.mxu2 %vm356_vm3, %v2164_v44 }
 0x22b   : > { %v1337_v49 = vpop.f32.mrf.mxu3 }
 0x22c   : > { %v1207_v50 = vpop.f32.mrf.mxu2  ;;  %v3162_v52 = vadd.f32 %v1337_v49, %v1242_v41  ;;  %v2137_v49 = vld [vmem:[%s3384_s1 + $0x458] sm:$0xff] }
 0x22d   : > { %v1243_v56 = vadd.f32 %v1207_v50, %v1110_v51  ;;  %v2169_v50 = vld [vmem:[%s3384_s1 + $0x558] sm:$0xff] }
 0x22e   : > { %v944_v54 = vpop.f32.mrf.mxu0 }
 0x22f   : > { %v978_v60 = vadd.f32 %v944_v54, %v2903_v55  ;;  %v2181_v55 = vld [vmem:[%s3384_s1 + $0x5b8] sm:$0xff]  ;;  %v1092_v11 = vpop.f32.mrf.mxu1 }
 0x230   : > { %2384 = vmatmul.msk.f32.gmra.mxu3 %vm356_vm3, %v2180_v43  ;;  %2356 = vmatmul.msk.f32.gmra.mxu1 %vm356_vm3, %v2154_v13  ;;  %v2157_v54 = vld [vmem:[%s3384_s1 + $0x4f8] sm:$0xff] }
 0x231   : > { %v1111_v62 = vadd.f32 %v1077_v5, %v978_v60  ;;  %2334 = vmatmul.msk.f32.gmra.mxu0 %vm356_vm3, %v2133_v57  ;;  %2368 = vmatmul.msk.f32.gmra.mxu2 %vm356_vm3, %v2165_v58 }
 0x233   : > { %v1340_v0 = vpop.f32.mrf.mxu3 }
 0x234   : > { %v1210_v1 = vpop.f32.mrf.mxu2  ;;  %v3181_v4 = vadd.f32 %v1340_v0, %v1243_v56  ;;  %v2138_v0 = vld [vmem:[%s3384_s1 + $0x460] sm:$0xff] }
 0x235   : > { %v1244_v6 = vadd.f32 %v1210_v1, %v1111_v62  ;;  %v2170_v1 = vld [vmem:[%s3384_s1 + $0x560] sm:$0xff] }
 0x236   : > { %v947_v5 = vpop.f32.mrf.mxu0 }
 0x237   : > { %v979_v12 = vadd.f32 %v947_v5, %v2921_v3  ;;  %v2182_v3 = vld [vmem:[%s3384_s1 + $0x5c0] sm:$0xff]  ;;  %v1095_v25 = vpop.f32.mrf.mxu1 }
 0x238   : > { %2385 = vmatmul.msk.f32.gmra.mxu3 %vm356_vm3, %v2181_v55  ;;  %2357 = vmatmul.msk.f32.gmra.mxu1 %vm356_vm3, %v2155_v28 }
 0x239   : > { %v1112_v9 = vadd.f32 %v1080_v19, %v979_v12  ;;  %2335 = vmatmul.msk.f32.gmra.mxu0 %vm356_vm3, %v2134_v7  ;;  %2369 = vmatmul.msk.f32.gmra.mxu2 %vm356_vm3, %v2166_v8 }
 0x23b   : > { %v1343_v14 = vpop.f32.mrf.mxu3 }
 0x23c   : > { %v1213_v17 = vpop.f32.mrf.mxu2  ;;  %v3200_v18 = vadd.f32 %v1343_v14, %v1244_v6 }
 0x23d   : > { %v1245_v21 = vadd.f32 %v1213_v17, %v1112_v9  ;;  %v2186_v9 = vld [vmem:[%s3384_s1 + $0x5e0] sm:$0xff] }
 0x23e   : > { %v950_v19 = vpop.f32.mrf.mxu0 }
 0x23f   : > { %v980_v26 = vadd.f32 %v950_v19, %v2939_v15  ;;  %v2183_v15 = vld [vmem:[%s3384_s1 + $0x5c8] sm:$0xff]  ;;  %v1098_v44 = vpop.f32.mrf.mxu1 }
 0x240   : > { %2386 = vmatmul.msk.f32.gmra.mxu3 %vm356_vm3, %v2182_v3  ;;  %2358 = vmatmul.msk.f32.gmra.mxu1 %vm356_vm3, %v2156_v38 }
 0x241   : > { %v1113_v20 = vadd.f32 %v1083_v33, %v980_v26  ;;  %2336 = vmatmul.msk.f32.gmra.mxu0 %vm356_vm3, %v2135_v22  ;;  %2370 = vmatmul.msk.f32.gmra.mxu2 %vm356_vm3, %v2167_v23  ;;  %v2187_v26 = vld [vmem:[%s3384_s1 + $0x5e8] sm:$0xff] }
 0x243   : > { %v1346_v30 = vpop.f32.mrf.mxu3 }
 0x244   : > { %v1216_v32 = vpop.f32.mrf.mxu2  ;;  %v3219_v40 = vadd.f32 %v1346_v30, %v1245_v21 }
 0x245   : > { %v1246_v34 = vadd.f32 %v1216_v32, %v1113_v20 }
 0x246   : > { %v953_v33 = vpop.f32.mrf.mxu0 }
 0x247   : > { %v981_v41 = vadd.f32 %v953_v33, %v2957_v27  ;;  %v2184_v27 = vld [vmem:[%s3384_s1 + $0x5d0] sm:$0xff] }
 0x248   : > { %2387 = vmatmul.msk.f32.gmra.mxu3 %vm356_vm3, %v2183_v15  ;;  %2359 = vmatmul.msk.f32.gmra.mxu1 %vm356_vm3, %v2157_v54 }
 0x249   : > { %v1114_v31 = vadd.f32 %v1086_v47, %v981_v41  ;;  %2337 = vmatmul.msk.f32.gmra.mxu0 %vm356_vm3, %v2136_v35  ;;  %2371 = vmatmul.msk.f32.gmra.mxu2 %vm356_vm3, %v2168_v36  ;;  %v2188_v36 = vld [vmem:[%s3384_s1 + $0x5f0] sm:$0xff] }
 0x24b   : > { %v1349_v42 = vpop.f32.mrf.mxu3 }
 0x24c   : > { %v1219_v46 = vpop.f32.mrf.mxu2  ;;  %v3238_v51 = vadd.f32 %v1349_v42, %v1246_v34 }
 0x24d   : > { %v1247_v48 = vadd.f32 %v1219_v46, %v1114_v31  ;;  %v2173_v31 = vld [vmem:[%s3384_s1 + $0x578] sm:$0xff] }
 0x24e   : > { %v956_v47 = vpop.f32.mrf.mxu0 }
 0x24f   : > { %v982_v56 = vadd.f32 %v956_v47, %v2975_v39  ;;  %v2185_v39 = vld [vmem:[%s3384_s1 + $0x5d8] sm:$0xff] }
 0x250   : > { %2388 = vmatmul.msk.f32.gmra.mxu3 %vm356_vm3, %v2184_v27 }
 0x251   : > { %v1115_v43 = vadd.f32 %v1089_v61, %v982_v56  ;;  %2338 = vmatmul.msk.f32.gmra.mxu0 %vm356_vm3, %v2137_v49  ;;  %2372 = vmatmul.msk.f32.gmra.mxu2 %vm356_vm3, %v2169_v50  ;;  %v1101_v61 = vpop.f32.mrf.mxu1  ;;  %v2189_v49 = vld [vmem:[%s3384_s1 + $0x5f8] sm:$0xff] }
 0x253   : > { %v1352_v57 = vpop.f32.mrf.mxu3 }
 0x254   : > { %v1222_v58 = vpop.f32.mrf.mxu2  ;;  %v3257_v60 = vadd.f32 %v1352_v57, %v1247_v48 }
 0x255   : > { %v1248_v62 = vadd.f32 %v1222_v58, %v1115_v43 }
 0x256   : > { %v959_v63 = vpop.f32.mrf.mxu0 }
 0x257   : > { %v983_v6 = vadd.f32 %v959_v63, %v2993_v53  ;;  %v2139_v53 = vld [vmem:[%s3384_s1 + $0x468] sm:$0xff] }
 0x258   : > { %2389 = vmatmul.msk.f32.gmra.mxu3 %vm356_vm3, %v2185_v39 }
 0x259   : > { %v1116_v55 = vadd.f32 %v1092_v11, %v983_v6  ;;  %2339 = vmatmul.msk.f32.gmra.mxu0 %vm356_vm3, %v2138_v0  ;;  %2373 = vmatmul.msk.f32.gmra.mxu2 %vm356_vm3, %v2170_v1  ;;  %v2171_v11 = vld [vmem:[%s3384_s1 + $0x568] sm:$0xff]  ;;  %v1588_v17 = vpop.f32.mrf.mxu1 }
 0x25b   : > { %v1355_v5 = vpop.f32.mrf.mxu3 }
 0x25c   : > { %v1225_v7 = vpop.f32.mrf.mxu2  ;;  %v3273_v8 = vadd.f32 %v1355_v5, %v1248_v62 }
 0x25d   : > { %v1249_v12 = vadd.f32 %v1225_v7, %v1116_v55 }
 0x25e   : > { %v962_v13 = vpop.f32.mrf.mxu0 }
 0x25f   : > { %v984_v14 = vadd.f32 %v962_v13, %v3011_v2  ;;  %v2140_v2 = vld [vmem:[%s3384_s1 + $0x470] sm:$0xff] }
 0x260   : > { %2390 = vmatmul.msk.f32.gmra.mxu3 %vm356_vm3, %v2186_v9 }
 0x261   : > { %v1117_v21 = vadd.f32 %v1095_v25, %v984_v14  ;;  %2340 = vmatmul.msk.f32.gmra.mxu0 %vm356_vm3, %v2139_v53  ;;  %2374 = vmatmul.msk.f32.gmra.mxu2 %vm356_vm3, %v2171_v11  ;;  %v2172_v25 = vld [vmem:[%s3384_s1 + $0x570] sm:$0xff]  ;;  %v1591_v32 = vpop.f32.mrf.mxu1 }
 0x263   : > { %v1358_v3 = vpop.f32.mrf.mxu3 }
 0x264   : > { %v1228_v19 = vpop.f32.mrf.mxu2  ;;  %v3288_v22 = vadd.f32 %v1358_v3, %v1249_v12 }
 0x265   : > { %v1250_v23 = vadd.f32 %v1228_v19, %v1117_v21 }
 0x266   : > { %v965_v20 = vpop.f32.mrf.mxu0 }
 0x267   : > { %v985_v28 = vadd.f32 %v965_v20, %v3029_v16  ;;  %v2141_v16 = vld [vmem:[%s3384_s1 + $0x478] sm:$0xff] }
 0x268   : > { %2391 = vmatmul.msk.f32.gmra.mxu3 %vm356_vm3, %v2187_v26 }
 0x269   : > { %v1118_v30 = vadd.f32 %v1098_v44, %v985_v28  ;;  %2341 = vmatmul.msk.f32.gmra.mxu0 %vm356_vm3, %v2140_v2  ;;  %2375 = vmatmul.msk.f32.gmra.mxu2 %vm356_vm3, %v2172_v25  ;;  %v1594_v46 = vpop.f32.mrf.mxu1 }
 0x26b   : > { %v1361_v34 = vpop.f32.mrf.mxu3 }
 0x26c   : > { %v1231_v15 = vpop.f32.mrf.mxu2  ;;  %v3303_v33 = vadd.f32 %v1361_v34, %v1250_v23 }
 0x26d   : > { %v1251_v35 = vadd.f32 %v1231_v15, %v1118_v30 }
 0x26e   : > { %v968_v41 = vpop.f32.mrf.mxu0 }
 0x26f   : > { %v986_v38 = vadd.f32 %v968_v41, %v3048_v29 }
 0x270   : > { %2392 = vmatmul.msk.f32.gmra.mxu3 %vm356_vm3, %v2188_v36 }
 0x271   : > { %v1119_v42 = vadd.f32 %v1101_v61, %v986_v38  ;;  %2342 = vmatmul.msk.f32.gmra.mxu0 %vm356_vm3, %v2141_v16  ;;  %2376 = vmatmul.msk.f32.gmra.mxu2 %vm356_vm3, %v2173_v31  ;;  %v1597_v57 = vpop.f32.mrf.mxu1 }
 0x273   : > { %v1364_v44 = vpop.f32.mrf.mxu3 }
 0x274   : > { %v1234_v48 = vpop.f32.mrf.mxu2  ;;  %v3318_v27 = vadd.f32 %v1364_v44, %v1251_v35 }
 0x275   : > { %v1252_v47 = vadd.f32 %v1234_v48, %v1119_v42 }
 0x276   : > { %v1455_v50 = vpop.f32.mrf.mxu0 }
 0x277   : > { %v1503_v56 = vadd.f32 %v1455_v50, %v3067_v45 }
 0x278   : > { %2393 = vmatmul.msk.f32.gmra.mxu3 %vm356_vm3, %v2189_v49 }
 0x279   : > { %v1636_v62 = vadd.f32 %v1588_v17, %v1503_v56  ;;  %v1600_v55 = vpop.f32.mrf.mxu1 }
 0x27b   : > { %v1367_v29 = vpop.f32.mrf.mxu3 }
 0x27c   : > { %v3325_v43 = vadd.f32 %v1367_v29, %v1252_v47  ;;  %v1721_v54 = vpop.f32.mrf.mxu2 }
 0x27d   : > { %v1769_v39 = vadd.f32 %v1721_v54, %v1636_v62 }
 0x27e   : > { %v1458_v58 = vpop.f32.mrf.mxu0 }
 0x27f   : > { %v1504_v63 = vadd.f32 %v1458_v58, %v3086_v59 }
 0x281   : > { %v1637_v5 = vadd.f32 %v1591_v32, %v1504_v63  ;;  %v1603_v17 = vpop.f32.mrf.mxu1 }
 0x283   : > { %v1854_v61 = vpop.f32.mrf.mxu3 }
 0x284   : > { %v1724_v0 = vpop.f32.mrf.mxu2  ;;  %v1902_v1 = vadd.f32 %v1854_v61, %v1769_v39 }
 0x285   : > { %v1770_v7 = vadd.f32 %v1724_v0, %v1637_v5 }
 0x286   : > { %v1918_v45 = vmax.f32 %v1902_v1, 0.0  ;;  %v1461_v6 = vpop.f32.mrf.mxu0 }
 0x287   : > { %v1505_v59 = vadd.f32 %v1461_v6, %v3105_v10 }
 0x288   : > { %1935 = vst.msk [vmem:[%s3332_s24] sm:$0xff] %vm1934_vm4, %v1918_v45 }
 0x289   : > { %v1638_v14 = vadd.f32 %v1594_v46, %v1505_v59  ;;  %v1606_v30 = vpop.f32.mrf.mxu1 }
 0x28b   : > { %v1857_v12 = vpop.f32.mrf.mxu3 }
 0x28c   : > { %v1727_v9 = vpop.f32.mrf.mxu2  ;;  %v1903_v13 = vadd.f32 %v1857_v12, %v1770_v7 }
 0x28d   : > { %v1771_v21 = vadd.f32 %v1727_v9, %v1638_v14 }
 0x28e   : > { %v1919_v53 = vmax.f32 %v1903_v13, 0.0  ;;  %v1464_v11 = vpop.f32.mrf.mxu0 }
 0x28f   : > { %v1506_v19 = vadd.f32 %v1464_v11, %v3124_v24 }
 0x290   : > { %1936 = vst.msk [vmem:[%s3332_s24 + $0x8] sm:$0xff] %vm1934_vm4, %v1919_v53 }
 0x291   : > { %v1639_v25 = vadd.f32 %v1597_v57, %v1506_v19  ;;  %v1609_v44 = vpop.f32.mrf.mxu1 }
 0x293   : > { %v1860_v3 = vpop.f32.mrf.mxu3 }
 0x294   : > { %v1730_v23 = vpop.f32.mrf.mxu2  ;;  %v1904_v26 = vadd.f32 %v1860_v3, %v1771_v21 }
 0x295   : > { %v1772_v10 = vadd.f32 %v1730_v23, %v1639_v25 }
 0x296   : > { %v1920_v20 = vmax.f32 %v1904_v26, 0.0  ;;  %v1467_v2 = vpop.f32.mrf.mxu0 }
 0x297   : > { %v1507_v32 = vadd.f32 %v1467_v2, %v3143_v37 }
 0x298   : > { %1937 = vst.msk [vmem:[%s3332_s24 + $0x10] sm:$0xff] %vm1934_vm4, %v1920_v20 }
 0x299   : > { %v1640_v41 = vadd.f32 %v1600_v55, %v1507_v32  ;;  %v1612_v58 = vpop.f32.mrf.mxu1 }
 0x29b   : > { %v1863_v28 = vpop.f32.mrf.mxu3 }
 0x29c   : > { %v1733_v34 = vpop.f32.mrf.mxu2  ;;  %v1905_v15 = vadd.f32 %v1863_v28, %v1772_v10 }
 0x29d   : > { %v1773_v24 = vadd.f32 %v1733_v34, %v1640_v41 }
 0x29e   : > { %v1921_v35 = vmax.f32 %v1905_v15, 0.0  ;;  %v1470_v36 = vpop.f32.mrf.mxu0 }
 0x29f   : > { %v1508_v31 = vadd.f32 %v1470_v36, %v3162_v52 }
 0x2a0   : > { %1938 = vst.msk [vmem:[%s3332_s24 + $0x18] sm:$0xff] %vm1934_vm4, %v1921_v35 }
 0x2a1   : > { %v1641_v47 = vadd.f32 %v1603_v17, %v1508_v31 }
 0x2a3   : > { %v1866_v16 = vpop.f32.mrf.mxu3 }
 0x2a4   : > { %v1736_v38 = vpop.f32.mrf.mxu2  ;;  %v1906_v42 = vadd.f32 %v1866_v16, %v1773_v24 }
 0x2a5   : > { %v1774_v37 = vadd.f32 %v1736_v38, %v1641_v47 }
 0x2a6   : > { %v1922_v46 = vmax.f32 %v1906_v42, 0.0  ;;  %v1473_v48 = vpop.f32.mrf.mxu0 }
 0x2a7   : > { %v1509_v50 = vadd.f32 %v1473_v48, %v3181_v4  ;;  %v1615_v4 = vpop.f32.mrf.mxu1 }
 0x2a8   : > { %1939 = vst.msk [vmem:[%s3332_s24 + $0x20] sm:$0xff] %vm1934_vm4, %v1922_v46 }
 0x2a9   : > { %v1642_v52 = vadd.f32 %v1606_v30, %v1509_v50 }
 0x2ab   : > { %v1869_v49 = vpop.f32.mrf.mxu3 }
 0x2ac   : > { %v1739_v29 = vpop.f32.mrf.mxu2  ;;  %v1907_v56 = vadd.f32 %v1869_v49, %v1774_v37 }
 0x2ad   : > { %v1775_v62 = vadd.f32 %v1739_v29, %v1642_v52 }
 0x2ae   : > { %v1923_v54 = vmax.f32 %v1907_v56, 0.0  ;;  %v1476_v57 = vpop.f32.mrf.mxu0 }
 0x2af   : > { %v1510_v61 = vadd.f32 %v1476_v57, %v3200_v18  ;;  %v1618_v14 = vpop.f32.mrf.mxu1 }
 0x2b0   : > { %1940 = vst.msk [vmem:[%s3332_s24 + $0x28] sm:$0xff] %vm1934_vm4, %v1923_v54 }
 0x2b1   : > { %v1643_v6 = vadd.f32 %v1609_v44, %v1510_v61 }
 0x2b3   : > { %v1872_v39 = vpop.f32.mrf.mxu3 }
 0x2b4   : > { %v1742_v63 = vpop.f32.mrf.mxu2  ;;  %v1908_v0 = vadd.f32 %v1872_v39, %v1775_v62 }
 0x2b5   : > { %v1776_v55 = vadd.f32 %v1742_v63, %v1643_v6 }
 0x2b6   : > { %v1924_v1 = vmax.f32 %v1908_v0, 0.0  ;;  %v1479_v45 = vpop.f32.mrf.mxu0 }
 0x2b7   : > { %v1511_v7 = vadd.f32 %v1479_v45, %v3219_v40  ;;  %v1621_v28 = vpop.f32.mrf.mxu1 }
 0x2b8   : > { %1941 = vst.msk [vmem:[%s3332_s24 + $0x30] sm:$0xff] %vm1934_vm4, %v1924_v1 }
 0x2b9   : > { %v1644_v53 = vadd.f32 %v1612_v58, %v1511_v7 }
 0x2bb   : > { %v1875_v5 = vpop.f32.mrf.mxu3 }
 0x2bc   : > { %v1745_v12 = vpop.f32.mrf.mxu2  ;;  %v1909_v59 = vadd.f32 %v1875_v5, %v1776_v55 }
 0x2bd   : > { %v1777_v18 = vadd.f32 %v1745_v12, %v1644_v53 }
 0x2be   : > { %v1925_v9 = vmax.f32 %v1909_v59, 0.0  ;;  %v1482_v13 = vpop.f32.mrf.mxu0 }
 0x2bf   : > { %v1512_v17 = vadd.f32 %v1482_v13, %v3238_v51  ;;  %v1624_v31 = vpop.f32.mrf.mxu1 }
 0x2c0   : > { %1942 = vst.msk [vmem:[%s3332_s24 + $0x38] sm:$0xff] %vm1934_vm4, %v1925_v9 }
 0x2c1   : > { %v1645_v26 = vadd.f32 %v1615_v4, %v1512_v17 }
 0x2c3   : > { %v1878_v11 = vpop.f32.mrf.mxu3 }
 0x2c4   : > { %v1748_v21 = vpop.f32.mrf.mxu2  ;;  %v1910_v3 = vadd.f32 %v1878_v11, %v1777_v18 }
 0x2c5   : > { %v1778_v40 = vadd.f32 %v1748_v21, %v1645_v26 }
 0x2c6   : > { %v1926_v19 = vmax.f32 %v1910_v3, 0.0  ;;  %v1485_v23 = vpop.f32.mrf.mxu0 }
 0x2c7   : > { %v1513_v2 = vadd.f32 %v1485_v23, %v3257_v60 }
 0x2c8   : > { %1943 = vst.msk [vmem:[%s3332_s24 + $0x40] sm:$0xff] %vm1934_vm4, %v1926_v19 }
 0x2c9   : > { %v1646_v34 = vadd.f32 %v1618_v14, %v1513_v2 }
 0x2cb   : > { %v1881_v20 = vpop.f32.mrf.mxu3 }
 0x2cc   : > { %v1751_v25 = vpop.f32.mrf.mxu2  ;;  %v1911_v10 = vadd.f32 %v1881_v20, %v1778_v40 }
 0x2cd   : > { %v1779_v51 = vadd.f32 %v1751_v25, %v1646_v34 }
 0x2ce   : > { %v1927_v30 = vmax.f32 %v1911_v10, 0.0  ;;  %v1488_v32 = vpop.f32.mrf.mxu0 }
 0x2cf   : > { %v1514_v35 = vadd.f32 %v1488_v32, %v3273_v8  ;;  %v1627_v8 = vpop.f32.mrf.mxu1 }
 0x2d0   : > { %1944 = vst.msk [vmem:[%s3332_s24 + $0x48] sm:$0xff] %vm1934_vm4, %v1927_v30 }
 0x2d1   : > { %v1647_v60 = vadd.f32 %v1621_v28, %v1514_v35 }
 0x2d3   : > { %v1884_v15 = vpop.f32.mrf.mxu3 }
 0x2d4   : > { %v1754_v36 = vpop.f32.mrf.mxu2  ;;  %v1912_v41 = vadd.f32 %v1884_v15, %v1779_v51 }
 0x2d5   : > { %v1780_v38 = vadd.f32 %v1754_v36, %v1647_v60 }
 0x2d6   : > { %v1928_v24 = vmax.f32 %v1912_v41, 0.0  ;;  %v1491_v16 = vpop.f32.mrf.mxu0 }
 0x2d7   : > { %v1515_v44 = vadd.f32 %v1491_v16, %v3288_v22  ;;  %v1630_v39 = vpop.f32.mrf.mxu1 }
 0x2d8   : > { %1945 = vst.msk [vmem:[%s3332_s24 + $0x50] sm:$0xff] %vm1934_vm4, %v1928_v24 }
 0x2d9   : > { %v1648_v49 = vadd.f32 %v1624_v31, %v1515_v44 }
 0x2db   : > { %v1887_v42 = vpop.f32.mrf.mxu3 }
 0x2dc   : > { %v1757_v46 = vpop.f32.mrf.mxu2  ;;  %v1913_v48 = vadd.f32 %v1887_v42, %v1780_v38 }
 0x2dd   : > { %v1781_v50 = vadd.f32 %v1757_v46, %v1648_v49 }
 0x2de   : > { %v1929_v47 = vmax.f32 %v1913_v48, 0.0  ;;  %v1494_v37 = vpop.f32.mrf.mxu0 }
 0x2df   : > { %v1516_v56 = vadd.f32 %v1494_v37, %v3303_v33  ;;  %v1633_v12 = vpop.f32.mrf.mxu1 }
 0x2e0   : > { %1946 = vst.msk [vmem:[%s3332_s24 + $0x58] sm:$0xff] %vm1934_vm4, %v1929_v47 }
 0x2e1   : > { %v1649_v62 = vadd.f32 %v1627_v8, %v1516_v56 }
 0x2e3   : > { %v1890_v29 = vpop.f32.mrf.mxu3 }
 0x2e4   : > { %v1760_v54 = vpop.f32.mrf.mxu2  ;;  %v1914_v57 = vadd.f32 %v1890_v29, %v1781_v50 }
 0x2e5   : > { %v1782_v22 = vadd.f32 %v1760_v54, %v1649_v62 }
 0x2e6   : > { %v1930_v58 = vmax.f32 %v1914_v57, 0.0  ;;  %v1497_v52 = vpop.f32.mrf.mxu0 }
 0x2e7   : > { %v1517_v63 = vadd.f32 %v1497_v52, %v3318_v27 }
 0x2e8   : > { %1947 = vst.msk [vmem:[%s3332_s24 + $0x60] sm:$0xff] %vm1934_vm4, %v1930_v58 }
 0x2e9   : > { %v1650_v6 = vadd.f32 %v1630_v39, %v1517_v63 }
 0x2eb   : > { %v1893_v61 = vpop.f32.mrf.mxu3 }
 0x2ec   : > { %v1915_v0 = vadd.f32 %v1893_v61, %v1782_v22  ;;  %v1763_v1 = vpop.f32.mrf.mxu2 }
 0x2ed   : > { %v1783_v4 = vadd.f32 %v1763_v1, %v1650_v6 }
 0x2ee   : > { %v1931_v45 = vmax.f32 %v1915_v0, 0.0  ;;  %v1500_v33 = vpop.f32.mrf.mxu0 }
 0x2ef   : > { %v1518_v5 = vadd.f32 %v1500_v33, %v3325_v43 }
 0x2f0   : > { %1948 = vst.msk [vmem:[%s3332_s24 + $0x68] sm:$0xff] %vm1934_vm4, %v1931_v45 }
 0x2f1   : > { %v1651_v13 = vadd.f32 %v1633_v12, %v1518_v5 }
 0x2f3   : > { %v1896_v55 = vpop.f32.mrf.mxu3 }
 0x2f4   : > { %v1916_v7 = vadd.f32 %v1896_v55, %v1783_v4  ;;  %v1766_v9 = vpop.f32.mrf.mxu2 }
 0x2f5   : > { %v1784_v27 = vadd.f32 %v1766_v9, %v1651_v13 }
 0x2f6   : > { %v1932_v59 = vmax.f32 %v1916_v7, 0.0 }
 0x2f8   : > { %1949 = vst.msk [vmem:[%s3332_s24 + $0x70] sm:$0xff] %vm1934_vm4, %v1932_v59 }
 0x2fb   : > { %v1899_v53 = vpop.f32.mrf.mxu3 }
 0x2fc   : > { %v1917_v18 = vadd.f32 %v1899_v53, %v1784_v27 }
 0x2fe   : > { %v1933_v11 = vmax.f32 %v1917_v18, 0.0 }
 0x300   : > { %1950 = vst.msk [vmem:[%s3332_s24 + $0x78] sm:$0xff] %vm1934_vm4, %v1933_v11 }
 0x301 PF: > { %s12_s9 = sadd.s32 1, %s2423_s9  }
 0x302   : > { %p9_p4 = scmp.ge.s32.totalorder %s12_s9, 4  }
 0x304   :  { %11 = sbr.rel (!%p9_p4) target bundleno = 1 (0x1), region = 69 }

</bundles_post_ra>
